<compile_context>
chip_gen: v7x
topology: tpu7x:2x2x1
jax: 0.10.0
libtpu: 0.0.40
codegen_flags: <defaults>
</compile_context>

<pallas_src>
import math

import jax
import jax.numpy as jnp
from jax.experimental import pallas as pl
from jax.experimental.pallas import tpu as pltpu

# Small synthetic RoBERTa config (real model is 768-hidden / 12 layers;
# weights are random here, not a checkpoint load).
MAX_LENGTH = 185
VOCAB = 25
PAD_IDX = 1
HIDDEN = 32
N_HEADS = 4
HEAD_DIM = HIDDEN // N_HEADS
INTERMEDIATE = 64
N_LAYERS = 2
LN_EPS = 1e-5
NEG_INF = -1e9


def _layernorm(x, g, b):
    mu = jnp.mean(x, axis=-1, keepdims=True)
    var = jnp.mean(jnp.square(x - mu), axis=-1, keepdims=True)
    return (x - mu) * jax.lax.rsqrt(var + LN_EPS) * g + b


# ----------------------------- fused encoder kernel -----------------------------

def _encoder_kernel(emb_ref, mrow_ref, mcol_ref, emb_g_ref, emb_b_ref,
                    wqkv_ref, bqkv_ref, wo_ref, bo_ref, ln1g_ref, ln1b_ref,
                    w1_ref, b1_ref, w2_ref, b2_ref, ln2g_ref, ln2b_ref,
                    out_ref, h_scr, qkv_scr, ctx_scr):
    layer = pl.program_id(1)

    # Embedding LayerNorm (no residual) only on the first layer step.
    @pl.when(layer == 0)
    def _init():
        h_scr[...] = _layernorm(emb_ref[0], emb_g_ref[...], emb_b_ref[...])

    h = h_scr[...]                                       # (S, H) f32

    # ---- self-attention block (fused QKV matmul) ----
    qkv_scr[...] = (
        jnp.dot(h.astype(jnp.bfloat16), wqkv_ref[0],
                preferred_element_type=jnp.float32) + bqkv_ref[0])

    bias = (1.0 - mrow_ref[0]) * NEG_INF                 # (1, S) additive mask
    scale = 1.0 / math.sqrt(HEAD_DIM)
    # Tiny heads (dh=8): unrolled per-head loop over static lane slices of the
    # QKV scratch.  TODO(synk): fold heads into one MXU tile at real scale.
    for hd in range(N_HEADS):
        c0 = hd * HEAD_DIM
        q = qkv_scr[:, c0:c0 + HEAD_DIM].astype(jnp.bfloat16)
        k = qkv_scr[:, HIDDEN + c0:HIDDEN + c0 + HEAD_DIM].astype(jnp.bfloat16)
        v = qkv_scr[:, 2 * HIDDEN + c0:2 * HIDDEN + c0 + HEAD_DIM].astype(jnp.bfloat16)
        s = jax.lax.dot_general(q, k, (((1,), (1,)), ((), ())),
                                preferred_element_type=jnp.float32) * scale
        s = s + bias
        s = s - jnp.max(s, axis=-1, keepdims=True)
        p = jnp.exp(s)
        p = p * pl.reciprocal(jnp.sum(p, axis=-1, keepdims=True), approx=True)
        ctx_scr[:, c0:c0 + HEAD_DIM] = jnp.dot(
            p.astype(jnp.bfloat16), v, preferred_element_type=jnp.float32)

    attn = (jnp.dot(ctx_scr[...].astype(jnp.bfloat16), wo_ref[0],
                    preferred_element_type=jnp.float32) + bo_ref[0])
    h1 = _layernorm(attn + h, ln1g_ref[0], ln1b_ref[0])

    # ---- feed-forward block ----
    inter = (jnp.dot(h1.astype(jnp.bfloat16), w1_ref[0],
                     preferred_element_type=jnp.float32) + b1_ref[0])
    # TODO(synk): HF RoBERTa "gelu" is exact erf GELU; tanh approximation used.
    inter = jax.nn.gelu(inter, approximate=True)
    ffn = (jnp.dot(inter.astype(jnp.bfloat16), w2_ref[0],
                   preferred_element_type=jnp.float32) + b2_ref[0])
    h2 = _layernorm(ffn + h1, ln2g_ref[0], ln2b_ref[0])
    h_scr[...] = h2

    # ---- masked mean pooling on the last layer step ----
    @pl.when(layer == pl.num_programs(1) - 1)
    def _pool():
        mcol = mcol_ref[0]                               # (S, 1)
        summ = jnp.sum(h2 * mcol, axis=0, keepdims=True)  # (1, H)
        cnt = jnp.sum(mcol, axis=0, keepdims=True)        # (1, 1)
        out_ref[0] = summ / jnp.maximum(cnt, 1.0)


def vhhbert_forward(params, input_ids, attention_mask):
    B, S = input_ids.shape
    mask_f = attention_mask.astype(jnp.float32)

    # RoBERTa embeddings: word + learned absolute position + token-type(0).
    # (Table gathers stay in XLA; the LayerNorm runs inside the fused kernel.)
    position_ids = jnp.cumsum(attention_mask, axis=1) * attention_mask + PAD_IDX
    emb = (params["word_emb"][input_ids]
           + params["pos_emb"][position_ids]
           + params["tt_emb"][0][None, None, :])         # (B, S, H) f32

    mask_row = mask_f.reshape(B, 1, S)                   # key-mask for attention
    mask_col = mask_f.reshape(B, S, 1)                   # pooling weights

    H, I, L = HIDDEN, INTERMEDIATE, N_LAYERS
    per_layer_mat = lambda k, n: pl.BlockSpec((1, k, n), lambda b, l: (l, 0, 0))
    per_layer_vec = lambda n: pl.BlockSpec((1, 1, n), lambda b, l: (l, 0, 0))

    pooled = pl.pallas_call(
        _encoder_kernel,
        out_shape=jax.ShapeDtypeStruct((B, 1, H), jnp.float32),
        grid=(B, L),
        in_specs=[
            pl.BlockSpec((1, S, H), lambda b, l: (b, 0, 0)),    # emb
            pl.BlockSpec((1, 1, S), lambda b, l: (b, 0, 0)),    # mask_row
            pl.BlockSpec((1, S, 1), lambda b, l: (b, 0, 0)),    # mask_col
            pl.BlockSpec((1, H), lambda b, l: (0, 0)),          # emb_ln_g
            pl.BlockSpec((1, H), lambda b, l: (0, 0)),          # emb_ln_b
            per_layer_mat(H, 3 * H),                            # wqkv
            per_layer_vec(3 * H),                               # bqkv
            per_layer_mat(H, H),                                # wo
            per_layer_vec(H),                                   # bo
            per_layer_vec(H),                                   # ln1_g
            per_layer_vec(H),                                   # ln1_b
            per_layer_mat(H, I),                                # w1
            per_layer_vec(I),                                   # b1
            per_layer_mat(I, H),                                # w2
            per_layer_vec(H),                                   # b2
            per_layer_vec(H),                                   # ln2_g
            per_layer_vec(H),                                   # ln2_b
        ],
        out_specs=pl.BlockSpec((1, 1, H), lambda b, l: (b, 0, 0)),
        scratch_shapes=[
            pltpu.VMEM((S, H), jnp.float32),        # resident hidden state
            pltpu.VMEM((S, 3 * H), jnp.float32),    # fused QKV
            pltpu.VMEM((S, H), jnp.float32),        # attention context
        ],
        compiler_params=pltpu.CompilerParams(
            dimension_semantics=("parallel", "arbitrary")),
    )(emb, mask_row, mask_col,
      params["emb_ln_g"], params["emb_ln_b"],
      params["wqkv"], params["bqkv"], params["wo"], params["bo"],
      params["ln1_g"], params["ln1_b"],
      params["w1"], params["b1"], params["w2"], params["b2"],
      params["ln2_g"], params["ln2_b"])

    return pooled.reshape(B, H)


# ----------------------------- parameters -----------------------------

def init_params(key):
    def nrm(k, shape, dtype=jnp.float32):
        return (0.02 * jax.random.normal(k, shape, jnp.float32)).astype(dtype)

    k = jax.random.split(key, 7)
    H, I, L = HIDDEN, INTERMEDIATE, N_LAYERS
    return dict(
        word_emb=nrm(k[0], (VOCAB, H)),
        pos_emb=nrm(k[1], (MAX_LENGTH, H)),
        tt_emb=nrm(k[2], (1, H)),
        emb_ln_g=jnp.ones((1, H), jnp.float32),
        emb_ln_b=jnp.zeros((1, H), jnp.float32),
        # Matmul weights stored bf16 (MXU-native); biases / LN params f32.
        wqkv=nrm(k[3], (L, H, 3 * H), jnp.bfloat16),
        bqkv=jnp.zeros((L, 1, 3 * H), jnp.float32),
        wo=nrm(k[4], (L, H, H), jnp.bfloat16),
        bo=jnp.zeros((L, 1, H), jnp.float32),
        ln1_g=jnp.ones((L, 1, H), jnp.float32),
        ln1_b=jnp.zeros((L, 1, H), jnp.float32),
        w1=nrm(k[5], (L, H, I), jnp.bfloat16),
        b1=jnp.zeros((L, 1, I), jnp.float32),
        w2=nrm(k[6], (L, I, H), jnp.bfloat16),
        b2=jnp.zeros((L, 1, H), jnp.float32),
        ln2_g=jnp.ones((L, 1, H), jnp.float32),
        ln2_b=jnp.zeros((L, 1, H), jnp.float32),
    )


if __name__ == "__main__":
    key = jax.random.PRNGKey(0)
    pkey, ikey = jax.random.split(key)
    params = init_params(pkey)

    B, S = 2, 8
    input_ids = jax.random.randint(ikey, (B, S), 0, VOCAB, dtype=jnp.int32)
    attention_mask = jnp.array([[1, 1, 1, 1, 1, 1, 1, 1],
                                [1, 1, 1, 1, 1, 0, 0, 0]], dtype=jnp.int32)

    out = jax.jit(vhhbert_forward)(params, input_ids, attention_mask)
    jax.block_until_ready(out)
    assert out.shape == (B, HIDDEN) and out.dtype == jnp.float32
    assert bool(jnp.all(jnp.isfinite(out)))
    print("KERNEL_OK")
</pallas_src>

<mosaic_0001>
module attributes {stable_mosaic.version = 11 : i64} {
  func.func @_encoder_kernel(%arg0: i32, %arg1: i32, %arg2: memref<1x8x32xf32, #tpu.memory_space<vmem>>, %arg3: memref<1x1x8xf32, #tpu.memory_space<vmem>>, %arg4: memref<1x8x1xf32, #tpu.memory_space<vmem>>, %arg5: memref<1x32xf32, #tpu.memory_space<vmem>>, %arg6: memref<1x32xf32, #tpu.memory_space<vmem>>, %arg7: memref<1x32x96xbf16, #tpu.memory_space<vmem>>, %arg8: memref<1x1x96xf32, #tpu.memory_space<vmem>>, %arg9: memref<1x32x32xbf16, #tpu.memory_space<vmem>>, %arg10: memref<1x1x32xf32, #tpu.memory_space<vmem>>, %arg11: memref<1x1x32xf32, #tpu.memory_space<vmem>>, %arg12: memref<1x1x32xf32, #tpu.memory_space<vmem>>, %arg13: memref<1x32x64xbf16, #tpu.memory_space<vmem>>, %arg14: memref<1x1x64xf32, #tpu.memory_space<vmem>>, %arg15: memref<1x64x32xbf16, #tpu.memory_space<vmem>>, %arg16: memref<1x1x32xf32, #tpu.memory_space<vmem>>, %arg17: memref<1x1x32xf32, #tpu.memory_space<vmem>>, %arg18: memref<1x1x32xf32, #tpu.memory_space<vmem>>, %arg19: memref<1x1x32xf32, #tpu.memory_space<vmem>>, %arg20: memref<8x32xf32, #tpu.memory_space<vmem>>, %arg21: memref<8x96xf32, #tpu.memory_space<vmem>>, %arg22: memref<8x32xf32, #tpu.memory_space<vmem>>) attributes {dimension_semantics = [#tpu.dimension_semantics<parallel>, #tpu.dimension_semantics<arbitrary>], iteration_bounds = array<i64: 2, 2>, scalar_prefetch = 0 : i64, scratch_operands = 3 : i64, tpu.core_type = #tpu.core_type<tc>, window_params = [{transform_indices = @transform_0, window_bounds = array<i64: 1, 8, 32>}, {transform_indices = @transform_1, window_bounds = array<i64: 1, 1, 8>}, {transform_indices = @transform_2, window_bounds = array<i64: 1, 8, 1>}, {pipeline_mode = #tpu.pipeline_mode<synchronous>, transform_indices = @transform_3, window_bounds = array<i64: 1, 32>}, {pipeline_mode = #tpu.pipeline_mode<synchronous>, transform_indices = @transform_4, window_bounds = array<i64: 1, 32>}, {transform_indices = @transform_5, window_bounds = array<i64: 1, 32, 96>}, {transform_indices = @transform_6, window_bounds = array<i64: 1, 1, 96>}, {transform_indices = @transform_7, window_bounds = array<i64: 1, 32, 32>}, {transform_indices = @transform_8, window_bounds = array<i64: 1, 1, 32>}, {transform_indices = @transform_9, window_bounds = array<i64: 1, 1, 32>}, {transform_indices = @transform_10, window_bounds = array<i64: 1, 1, 32>}, {transform_indices = @transform_11, window_bounds = array<i64: 1, 32, 64>}, {transform_indices = @transform_12, window_bounds = array<i64: 1, 1, 64>}, {transform_indices = @transform_13, window_bounds = array<i64: 1, 64, 32>}, {transform_indices = @transform_14, window_bounds = array<i64: 1, 1, 32>}, {transform_indices = @transform_15, window_bounds = array<i64: 1, 1, 32>}, {transform_indices = @transform_16, window_bounds = array<i64: 1, 1, 32>}, {transform_indices = @transform_17, window_bounds = array<i64: 1, 1, 32>}]} {
    %c0_i32 = arith.constant 0 : i32
    %0 = arith.cmpi eq, %arg1, %c0_i32 : i32
    %1 = arith.extui %0 : i1 to i32
    %c0_i32_0 = arith.constant 0 : i32
    %2 = arith.cmpi ne, %1, %c0_i32_0 : i32
    scf.if %2 {
      %c0_108 = arith.constant 0 : index
      %c0_109 = arith.constant 0 : index
      %c0_110 = arith.constant 0 : index
      %211 = vector.load %arg2[%c0_108, %c0_109, %c0_110] : memref<1x8x32xf32, #tpu.memory_space<vmem>>, vector<1x8x32xf32>
      %212 = vector.shape_cast %211 : vector<1x8x32xf32> to vector<8x32xf32>
      %c0_111 = arith.constant 0 : index
      %c0_112 = arith.constant 0 : index
      %213 = vector.load %arg5[%c0_111, %c0_112] : memref<1x32xf32, #tpu.memory_space<vmem>>, vector<1x32xf32>
      %c0_113 = arith.constant 0 : index
      %c0_114 = arith.constant 0 : index
      %214 = vector.load %arg6[%c0_113, %c0_114] : memref<1x32xf32, #tpu.memory_space<vmem>>, vector<1x32xf32>
      %cst_115 = arith.constant dense<0.000000e+00> : vector<8xf32>
      %215 = vector.multi_reduction <add>, %212, %cst_115 [1] : vector<8x32xf32> to vector<8xf32>
      %216 = vector.shape_cast %215 : vector<8xf32> to vector<8x1xf32>
      %cst_116 = arith.constant 3.200000e+01 : f32
      %217 = vector.broadcast %cst_116 : f32 to vector<8x1xf32>
      %218 = arith.divf %216, %217 : vector<8x1xf32>
      %219 = vector.broadcast %218 : vector<8x1xf32> to vector<8x32xf32>
      %220 = arith.subf %212, %219 : vector<8x32xf32>
      %221 = arith.mulf %220, %220 : vector<8x32xf32>
      %cst_117 = arith.constant dense<0.000000e+00> : vector<8xf32>
      %222 = vector.multi_reduction <add>, %221, %cst_117 [1] : vector<8x32xf32> to vector<8xf32>
      %223 = vector.shape_cast %222 : vector<8xf32> to vector<8x1xf32>
      %cst_118 = arith.constant 3.200000e+01 : f32
      %224 = vector.broadcast %cst_118 : f32 to vector<8x1xf32>
      %225 = arith.divf %223, %224 : vector<8x1xf32>
      %226 = vector.broadcast %218 : vector<8x1xf32> to vector<8x32xf32>
      %227 = arith.subf %212, %226 : vector<8x32xf32>
      %cst_119 = arith.constant 9.99999974E-6 : f32
      %228 = vector.broadcast %cst_119 : f32 to vector<8x1xf32>
      %229 = arith.addf %225, %228 : vector<8x1xf32>
      %230 = math.rsqrt %229 : vector<8x1xf32>
      %231 = vector.broadcast %230 : vector<8x1xf32> to vector<8x32xf32>
      %232 = arith.mulf %227, %231 : vector<8x32xf32>
      %233 = vector.broadcast %213 : vector<1x32xf32> to vector<8x32xf32>
      %234 = arith.mulf %232, %233 : vector<8x32xf32>
      %235 = vector.broadcast %214 : vector<1x32xf32> to vector<8x32xf32>
      %236 = arith.addf %234, %235 : vector<8x32xf32>
      %c0_120 = arith.constant 0 : index
      %c0_121 = arith.constant 0 : index
      %237 = vector.load %arg20[%c0_120, %c0_121] : memref<8x32xf32, #tpu.memory_space<vmem>>, vector<8x32xf32>
      tpu.vector_store %arg20[%c0_120, %c0_121], %236 {strides = array<i32>} : memref<8x32xf32, #tpu.memory_space<vmem>>, vector<8x32xf32>,
    } else {
    }
    %c0 = arith.constant 0 : index
    %c0_1 = arith.constant 0 : index
    %3 = vector.load %arg20[%c0, %c0_1] : memref<8x32xf32, #tpu.memory_space<vmem>>, vector<8x32xf32>
    %4 = arith.truncf %3 : vector<8x32xf32> to vector<8x32xbf16>
    %c0_2 = arith.constant 0 : index
    %c0_3 = arith.constant 0 : index
    %c0_4 = arith.constant 0 : index
    %5 = vector.load %arg7[%c0_2, %c0_3, %c0_4] : memref<1x32x96xbf16, #tpu.memory_space<vmem>>, vector<1x32x96xbf16>
    %6 = vector.shape_cast %5 : vector<1x32x96xbf16> to vector<32x96xbf16>
    %cst = arith.constant dense<0.000000e+00> : vector<8x96xf32>
    %7 = tpu.matmul %4, %6, %cst {dimension_numbers = #tpu.dot_dimension_numbers<[1], [0], [0], [1], [0, 0, 1, 1], [], []>} : vector<8x32xbf16>, vector<32x96xbf16>, vector<8x96xf32> -> vector<8x96xf32>
    %c0_5 = arith.constant 0 : index
    %c0_6 = arith.constant 0 : index
    %c0_7 = arith.constant 0 : index
    %8 = vector.load %arg8[%c0_5, %c0_6, %c0_7] : memref<1x1x96xf32, #tpu.memory_space<vmem>>, vector<1x1x96xf32>
    %9 = vector.shape_cast %8 : vector<1x1x96xf32> to vector<1x96xf32>
    %10 = vector.broadcast %9 : vector<1x96xf32> to vector<8x96xf32>
    %11 = arith.addf %7, %10 : vector<8x96xf32>
    %c0_8 = arith.constant 0 : index
    %c0_9 = arith.constant 0 : index
    %12 = vector.load %arg21[%c0_8, %c0_9] : memref<8x96xf32, #tpu.memory_space<vmem>>, vector<8x96xf32>
    tpu.vector_store %arg21[%c0_8, %c0_9], %11 {strides = array<i32>} : memref<8x96xf32, #tpu.memory_space<vmem>>, vector<8x96xf32>,
    %c0_10 = arith.constant 0 : index
    %c0_11 = arith.constant 0 : index
    %c0_12 = arith.constant 0 : index
    %13 = vector.load %arg3[%c0_10, %c0_11, %c0_12] : memref<1x1x8xf32, #tpu.memory_space<vmem>>, vector<1x1x8xf32>
    %14 = vector.shape_cast %13 : vector<1x1x8xf32> to vector<1x8xf32>
    %cst_13 = arith.constant 1.000000e+00 : f32
    %15 = vector.broadcast %cst_13 : f32 to vector<1x8xf32>
    %16 = arith.subf %15, %14 : vector<1x8xf32>
    %cst_14 = arith.constant -1.000000e+09 : f32
    %17 = vector.broadcast %cst_14 : f32 to vector<1x8xf32>
    %18 = arith.mulf %16, %17 : vector<1x8xf32>
    %c0_15 = arith.constant 0 : index
    %c0_16 = arith.constant 0 : index
    %19 = vector.load %arg21[%c0_15, %c0_16] : memref<8x96xf32, #tpu.memory_space<vmem>>, vector<8x8xf32>
    %20 = arith.truncf %19 : vector<8x8xf32> to vector<8x8xbf16>
    %c0_17 = arith.constant 0 : index
    %c32 = arith.constant 32 : index
    %21 = vector.load %arg21[%c0_17, %c32] : memref<8x96xf32, #tpu.memory_space<vmem>>, vector<8x8xf32>
    %22 = arith.truncf %21 : vector<8x8xf32> to vector<8x8xbf16>
    %c0_18 = arith.constant 0 : index
    %c64 = arith.constant 64 : index
    %23 = vector.load %arg21[%c0_18, %c64] : memref<8x96xf32, #tpu.memory_space<vmem>>, vector<8x8xf32>
    %24 = arith.truncf %23 : vector<8x8xf32> to vector<8x8xbf16>
    %cst_19 = arith.constant dense<0.000000e+00> : vector<8x8xf32>
    %25 = tpu.matmul %20, %22, %cst_19 {dimension_numbers = #tpu.dot_dimension_numbers<[1], [1], [0], [0], [0, 0, 1, 0], [], []>} : vector<8x8xbf16>, vector<8x8xbf16>, vector<8x8xf32> -> vector<8x8xf32>
    %cst_20 = arith.constant 0.353553385 : f32
    %26 = vector.broadcast %cst_20 : f32 to vector<8x8xf32>
    %27 = arith.mulf %25, %26 : vector<8x8xf32>
    %28 = vector.broadcast %18 : vector<1x8xf32> to vector<8x8xf32>
    %29 = arith.addf %27, %28 : vector<8x8xf32>
    %cst_21 = arith.constant dense<0xFF800000> : vector<8xf32>
    %30 = vector.multi_reduction <maximumf>, %29, %cst_21 [1] : vector<8x8xf32> to vector<8xf32>
    %31 = vector.shape_cast %30 : vector<8xf32> to vector<8x1xf32>
    %32 = vector.broadcast %31 : vector<8x1xf32> to vector<8x8xf32>
    %33 = arith.subf %29, %32 : vector<8x8xf32>
    %34 = math.exp %33 : vector<8x8xf32>
    %cst_22 = arith.constant dense<0.000000e+00> : vector<8xf32>
    %35 = vector.multi_reduction <add>, %34, %cst_22 [1] : vector<8x8xf32> to vector<8xf32>
    %36 = vector.shape_cast %35 : vector<8xf32> to vector<8x1xf32>
    %37 = tpu.reciprocal %36 {approx = true} : vector<8x1xf32> -> vector<8x1xf32>
    %38 = vector.broadcast %37 : vector<8x1xf32> to vector<8x8xf32>
    %39 = arith.mulf %34, %38 : vector<8x8xf32>
    %40 = arith.truncf %39 : vector<8x8xf32> to vector<8x8xbf16>
    %cst_23 = arith.constant dense<0.000000e+00> : vector<8x8xf32>
    %41 = tpu.matmul %40, %24, %cst_23 {dimension_numbers = #tpu.dot_dimension_numbers<[1], [0], [0], [1], [0, 0, 1, 1], [], []>} : vector<8x8xbf16>, vector<8x8xbf16>, vector<8x8xf32> -> vector<8x8xf32>
    %c0_24 = arith.constant 0 : index
    %c0_25 = arith.constant 0 : index
    %42 = vector.load %arg22[%c0_24, %c0_25] : memref<8x32xf32, #tpu.memory_space<vmem>>, vector<8x8xf32>
    tpu.vector_store %arg22[%c0_24, %c0_25], %41 {strides = array<i32>} : memref<8x32xf32, #tpu.memory_space<vmem>>, vector<8x8xf32>,
    %c0_26 = arith.constant 0 : index
    %c8 = arith.constant 8 : index
    %43 = vector.load %arg21[%c0_26, %c8] : memref<8x96xf32, #tpu.memory_space<vmem>>, vector<8x8xf32>
    %44 = arith.truncf %43 : vector<8x8xf32> to vector<8x8xbf16>
    %c0_27 = arith.constant 0 : index
    %c40 = arith.constant 40 : index
    %45 = vector.load %arg21[%c0_27, %c40] : memref<8x96xf32, #tpu.memory_space<vmem>>, vector<8x8xf32>
    %46 = arith.truncf %45 : vector<8x8xf32> to vector<8x8xbf16>
    %c0_28 = arith.constant 0 : index
    %c72 = arith.constant 72 : index
    %47 = vector.load %arg21[%c0_28, %c72] : memref<8x96xf32, #tpu.memory_space<vmem>>, vector<8x8xf32>
    %48 = arith.truncf %47 : vector<8x8xf32> to vector<8x8xbf16>
    %cst_29 = arith.constant dense<0.000000e+00> : vector<8x8xf32>
    %49 = tpu.matmul %44, %46, %cst_29 {dimension_numbers = #tpu.dot_dimension_numbers<[1], [1], [0], [0], [0, 0, 1, 0], [], []>} : vector<8x8xbf16>, vector<8x8xbf16>, vector<8x8xf32> -> vector<8x8xf32>
    %cst_30 = arith.constant 0.353553385 : f32
    %50 = vector.broadcast %cst_30 : f32 to vector<8x8xf32>
    %51 = arith.mulf %49, %50 : vector<8x8xf32>
    %52 = vector.broadcast %18 : vector<1x8xf32> to vector<8x8xf32>
    %53 = arith.addf %51, %52 : vector<8x8xf32>
    %cst_31 = arith.constant dense<0xFF800000> : vector<8xf32>
    %54 = vector.multi_reduction <maximumf>, %53, %cst_31 [1] : vector<8x8xf32> to vector<8xf32>
    %55 = vector.shape_cast %54 : vector<8xf32> to vector<8x1xf32>
    %56 = vector.broadcast %55 : vector<8x1xf32> to vector<8x8xf32>
    %57 = arith.subf %53, %56 : vector<8x8xf32>
    %58 = math.exp %57 : vector<8x8xf32>
    %cst_32 = arith.constant dense<0.000000e+00> : vector<8xf32>
    %59 = vector.multi_reduction <add>, %58, %cst_32 [1] : vector<8x8xf32> to vector<8xf32>
    %60 = vector.shape_cast %59 : vector<8xf32> to vector<8x1xf32>
    %61 = tpu.reciprocal %60 {approx = true} : vector<8x1xf32> -> vector<8x1xf32>
    %62 = vector.broadcast %61 : vector<8x1xf32> to vector<8x8xf32>
    %63 = arith.mulf %58, %62 : vector<8x8xf32>
    %64 = arith.truncf %63 : vector<8x8xf32> to vector<8x8xbf16>
    %cst_33 = arith.constant dense<0.000000e+00> : vector<8x8xf32>
    %65 = tpu.matmul %64, %48, %cst_33 {dimension_numbers = #tpu.dot_dimension_numbers<[1], [0], [0], [1], [0, 0, 1, 1], [], []>} : vector<8x8xbf16>, vector<8x8xbf16>, vector<8x8xf32> -> vector<8x8xf32>
    %c0_34 = arith.constant 0 : index
    %c8_35 = arith.constant 8 : index
    %66 = vector.load %arg22[%c0_34, %c8_35] : memref<8x32xf32, #tpu.memory_space<vmem>>, vector<8x8xf32>
    tpu.vector_store %arg22[%c0_34, %c8_35], %65 {strides = array<i32>} : memref<8x32xf32, #tpu.memory_space<vmem>>, vector<8x8xf32>,
    %c0_36 = arith.constant 0 : index
    %c16 = arith.constant 16 : index
    %67 = vector.load %arg21[%c0_36, %c16] : memref<8x96xf32, #tpu.memory_space<vmem>>, vector<8x8xf32>
    %68 = arith.truncf %67 : vector<8x8xf32> to vector<8x8xbf16>
    %c0_37 = arith.constant 0 : index
    %c48 = arith.constant 48 : index
    %69 = vector.load %arg21[%c0_37, %c48] : memref<8x96xf32, #tpu.memory_space<vmem>>, vector<8x8xf32>
    %70 = arith.truncf %69 : vector<8x8xf32> to vector<8x8xbf16>
    %c0_38 = arith.constant 0 : index
    %c80 = arith.constant 80 : index
    %71 = vector.load %arg21[%c0_38, %c80] : memref<8x96xf32, #tpu.memory_space<vmem>>, vector<8x8xf32>
    %72 = arith.truncf %71 : vector<8x8xf32> to vector<8x8xbf16>
    %cst_39 = arith.constant dense<0.000000e+00> : vector<8x8xf32>
    %73 = tpu.matmul %68, %70, %cst_39 {dimension_numbers = #tpu.dot_dimension_numbers<[1], [1], [0], [0], [0, 0, 1, 0], [], []>} : vector<8x8xbf16>, vector<8x8xbf16>, vector<8x8xf32> -> vector<8x8xf32>
    %cst_40 = arith.constant 0.353553385 : f32
    %74 = vector.broadcast %cst_40 : f32 to vector<8x8xf32>
    %75 = arith.mulf %73, %74 : vector<8x8xf32>
    %76 = vector.broadcast %18 : vector<1x8xf32> to vector<8x8xf32>
    %77 = arith.addf %75, %76 : vector<8x8xf32>
    %cst_41 = arith.constant dense<0xFF800000> : vector<8xf32>
    %78 = vector.multi_reduction <maximumf>, %77, %cst_41 [1] : vector<8x8xf32> to vector<8xf32>
    %79 = vector.shape_cast %78 : vector<8xf32> to vector<8x1xf32>
    %80 = vector.broadcast %79 : vector<8x1xf32> to vector<8x8xf32>
    %81 = arith.subf %77, %80 : vector<8x8xf32>
    %82 = math.exp %81 : vector<8x8xf32>
    %cst_42 = arith.constant dense<0.000000e+00> : vector<8xf32>
    %83 = vector.multi_reduction <add>, %82, %cst_42 [1] : vector<8x8xf32> to vector<8xf32>
    %84 = vector.shape_cast %83 : vector<8xf32> to vector<8x1xf32>
    %85 = tpu.reciprocal %84 {approx = true} : vector<8x1xf32> -> vector<8x1xf32>
    %86 = vector.broadcast %85 : vector<8x1xf32> to vector<8x8xf32>
    %87 = arith.mulf %82, %86 : vector<8x8xf32>
    %88 = arith.truncf %87 : vector<8x8xf32> to vector<8x8xbf16>
    %cst_43 = arith.constant dense<0.000000e+00> : vector<8x8xf32>
    %89 = tpu.matmul %88, %72, %cst_43 {dimension_numbers = #tpu.dot_dimension_numbers<[1], [0], [0], [1], [0, 0, 1, 1], [], []>} : vector<8x8xbf16>, vector<8x8xbf16>, vector<8x8xf32> -> vector<8x8xf32>
    %c0_44 = arith.constant 0 : index
    %c16_45 = arith.constant 16 : index
    %90 = vector.load %arg22[%c0_44, %c16_45] : memref<8x32xf32, #tpu.memory_space<vmem>>, vector<8x8xf32>
    tpu.vector_store %arg22[%c0_44, %c16_45], %89 {strides = array<i32>} : memref<8x32xf32, #tpu.memory_space<vmem>>, vector<8x8xf32>,
    %c0_46 = arith.constant 0 : index
    %c24 = arith.constant 24 : index
    %91 = vector.load %arg21[%c0_46, %c24] : memref<8x96xf32, #tpu.memory_space<vmem>>, vector<8x8xf32>
    %92 = arith.truncf %91 : vector<8x8xf32> to vector<8x8xbf16>
    %c0_47 = arith.constant 0 : index
    %c56 = arith.constant 56 : index
    %93 = vector.load %arg21[%c0_47, %c56] : memref<8x96xf32, #tpu.memory_space<vmem>>, vector<8x8xf32>
    %94 = arith.truncf %93 : vector<8x8xf32> to vector<8x8xbf16>
    %c0_48 = arith.constant 0 : index
    %c88 = arith.constant 88 : index
    %95 = vector.load %arg21[%c0_48, %c88] : memref<8x96xf32, #tpu.memory_space<vmem>>, vector<8x8xf32>
    %96 = arith.truncf %95 : vector<8x8xf32> to vector<8x8xbf16>
    %cst_49 = arith.constant dense<0.000000e+00> : vector<8x8xf32>
    %97 = tpu.matmul %92, %94, %cst_49 {dimension_numbers = #tpu.dot_dimension_numbers<[1], [1], [0], [0], [0, 0, 1, 0], [], []>} : vector<8x8xbf16>, vector<8x8xbf16>, vector<8x8xf32> -> vector<8x8xf32>
    %cst_50 = arith.constant 0.353553385 : f32
    %98 = vector.broadcast %cst_50 : f32 to vector<8x8xf32>
    %99 = arith.mulf %97, %98 : vector<8x8xf32>
    %100 = vector.broadcast %18 : vector<1x8xf32> to vector<8x8xf32>
    %101 = arith.addf %99, %100 : vector<8x8xf32>
    %cst_51 = arith.constant dense<0xFF800000> : vector<8xf32>
    %102 = vector.multi_reduction <maximumf>, %101, %cst_51 [1] : vector<8x8xf32> to vector<8xf32>
    %103 = vector.shape_cast %102 : vector<8xf32> to vector<8x1xf32>
    %104 = vector.broadcast %103 : vector<8x1xf32> to vector<8x8xf32>
    %105 = arith.subf %101, %104 : vector<8x8xf32>
    %106 = math.exp %105 : vector<8x8xf32>
    %cst_52 = arith.constant dense<0.000000e+00> : vector<8xf32>
    %107 = vector.multi_reduction <add>, %106, %cst_52 [1] : vector<8x8xf32> to vector<8xf32>
    %108 = vector.shape_cast %107 : vector<8xf32> to vector<8x1xf32>
    %109 = tpu.reciprocal %108 {approx = true} : vector<8x1xf32> -> vector<8x1xf32>
    %110 = vector.broadcast %109 : vector<8x1xf32> to vector<8x8xf32>
    %111 = arith.mulf %106, %110 : vector<8x8xf32>
    %112 = arith.truncf %111 : vector<8x8xf32> to vector<8x8xbf16>
    %cst_53 = arith.constant dense<0.000000e+00> : vector<8x8xf32>
    %113 = tpu.matmul %112, %96, %cst_53 {dimension_numbers = #tpu.dot_dimension_numbers<[1], [0], [0], [1], [0, 0, 1, 1], [], []>} : vector<8x8xbf16>, vector<8x8xbf16>, vector<8x8xf32> -> vector<8x8xf32>
    %c0_54 = arith.constant 0 : index
    %c24_55 = arith.constant 24 : index
    %114 = vector.load %arg22[%c0_54, %c24_55] : memref<8x32xf32, #tpu.memory_space<vmem>>, vector<8x8xf32>
    tpu.vector_store %arg22[%c0_54, %c24_55], %113 {strides = array<i32>} : memref<8x32xf32, #tpu.memory_space<vmem>>, vector<8x8xf32>,
    %c0_56 = arith.constant 0 : index
    %c0_57 = arith.constant 0 : index
    %115 = vector.load %arg22[%c0_56, %c0_57] : memref<8x32xf32, #tpu.memory_space<vmem>>, vector<8x32xf32>
    %116 = arith.truncf %115 : vector<8x32xf32> to vector<8x32xbf16>
    %c0_58 = arith.constant 0 : index
    %c0_59 = arith.constant 0 : index
    %c0_60 = arith.constant 0 : index
    %117 = vector.load %arg9[%c0_58, %c0_59, %c0_60] : memref<1x32x32xbf16, #tpu.memory_space<vmem>>, vector<1x32x32xbf16>
    %118 = vector.shape_cast %117 : vector<1x32x32xbf16> to vector<32x32xbf16>
    %cst_61 = arith.constant dense<0.000000e+00> : vector<8x32xf32>
    %119 = tpu.matmul %116, %118, %cst_61 {dimension_numbers = #tpu.dot_dimension_numbers<[1], [0], [0], [1], [0, 0, 1, 1], [], []>} : vector<8x32xbf16>, vector<32x32xbf16>, vector<8x32xf32> -> vector<8x32xf32>
    %c0_62 = arith.constant 0 : index
    %c0_63 = arith.constant 0 : index
    %c0_64 = arith.constant 0 : index
    %120 = vector.load %arg10[%c0_62, %c0_63, %c0_64] : memref<1x1x32xf32, #tpu.memory_space<vmem>>, vector<1x1x32xf32>
    %121 = vector.shape_cast %120 : vector<1x1x32xf32> to vector<1x32xf32>
    %122 = vector.broadcast %121 : vector<1x32xf32> to vector<8x32xf32>
    %123 = arith.addf %119, %122 : vector<8x32xf32>
    %124 = arith.addf %123, %3 : vector<8x32xf32>
    %c0_65 = arith.constant 0 : index
    %c0_66 = arith.constant 0 : index
    %c0_67 = arith.constant 0 : index
    %125 = vector.load %arg11[%c0_65, %c0_66, %c0_67] : memref<1x1x32xf32, #tpu.memory_space<vmem>>, vector<1x1x32xf32>
    %126 = vector.shape_cast %125 : vector<1x1x32xf32> to vector<1x32xf32>
    %c0_68 = arith.constant 0 : index
    %c0_69 = arith.constant 0 : index
    %c0_70 = arith.constant 0 : index
    %127 = vector.load %arg12[%c0_68, %c0_69, %c0_70] : memref<1x1x32xf32, #tpu.memory_space<vmem>>, vector<1x1x32xf32>
    %128 = vector.shape_cast %127 : vector<1x1x32xf32> to vector<1x32xf32>
    %cst_71 = arith.constant dense<0.000000e+00> : vector<8xf32>
    %129 = vector.multi_reduction <add>, %124, %cst_71 [1] : vector<8x32xf32> to vector<8xf32>
    %130 = vector.shape_cast %129 : vector<8xf32> to vector<8x1xf32>
    %cst_72 = arith.constant 3.200000e+01 : f32
    %131 = vector.broadcast %cst_72 : f32 to vector<8x1xf32>
    %132 = arith.divf %130, %131 : vector<8x1xf32>
    %133 = vector.broadcast %132 : vector<8x1xf32> to vector<8x32xf32>
    %134 = arith.subf %124, %133 : vector<8x32xf32>
    %135 = arith.mulf %134, %134 : vector<8x32xf32>
    %cst_73 = arith.constant dense<0.000000e+00> : vector<8xf32>
    %136 = vector.multi_reduction <add>, %135, %cst_73 [1] : vector<8x32xf32> to vector<8xf32>
    %137 = vector.shape_cast %136 : vector<8xf32> to vector<8x1xf32>
    %cst_74 = arith.constant 3.200000e+01 : f32
    %138 = vector.broadcast %cst_74 : f32 to vector<8x1xf32>
    %139 = arith.divf %137, %138 : vector<8x1xf32>
    %140 = vector.broadcast %132 : vector<8x1xf32> to vector<8x32xf32>
    %141 = arith.subf %124, %140 : vector<8x32xf32>
    %cst_75 = arith.constant 9.99999974E-6 : f32
    %142 = vector.broadcast %cst_75 : f32 to vector<8x1xf32>
    %143 = arith.addf %139, %142 : vector<8x1xf32>
    %144 = math.rsqrt %143 : vector<8x1xf32>
    %145 = vector.broadcast %144 : vector<8x1xf32> to vector<8x32xf32>
    %146 = arith.mulf %141, %145 : vector<8x32xf32>
    %147 = vector.broadcast %126 : vector<1x32xf32> to vector<8x32xf32>
    %148 = arith.mulf %146, %147 : vector<8x32xf32>
    %149 = vector.broadcast %128 : vector<1x32xf32> to vector<8x32xf32>
    %150 = arith.addf %148, %149 : vector<8x32xf32>
    %151 = arith.truncf %150 : vector<8x32xf32> to vector<8x32xbf16>
    %c0_76 = arith.constant 0 : index
    %c0_77 = arith.constant 0 : index
    %c0_78 = arith.constant 0 : index
    %152 = vector.load %arg13[%c0_76, %c0_77, %c0_78] : memref<1x32x64xbf16, #tpu.memory_space<vmem>>, vector<1x32x64xbf16>
    %153 = vector.shape_cast %152 : vector<1x32x64xbf16> to vector<32x64xbf16>
    %cst_79 = arith.constant dense<0.000000e+00> : vector<8x64xf32>
    %154 = tpu.matmul %151, %153, %cst_79 {dimension_numbers = #tpu.dot_dimension_numbers<[1], [0], [0], [1], [0, 0, 1, 1], [], []>} : vector<8x32xbf16>, vector<32x64xbf16>, vector<8x64xf32> -> vector<8x64xf32>
    %c0_80 = arith.constant 0 : index
    %c0_81 = arith.constant 0 : index
    %c0_82 = arith.constant 0 : index
    %155 = vector.load %arg14[%c0_80, %c0_81, %c0_82] : memref<1x1x64xf32, #tpu.memory_space<vmem>>, vector<1x1x64xf32>
    %156 = vector.shape_cast %155 : vector<1x1x64xf32> to vector<1x64xf32>
    %157 = vector.broadcast %156 : vector<1x64xf32> to vector<8x64xf32>
    %158 = arith.addf %154, %157 : vector<8x64xf32>
    %159 = arith.mulf %158, %158 : vector<8x64xf32>
    %160 = arith.mulf %158, %159 : vector<8x64xf32>
    %cst_83 = arith.constant 4.471500e-02 : f32
    %161 = vector.broadcast %cst_83 : f32 to vector<8x64xf32>
    %162 = arith.mulf %161, %160 : vector<8x64xf32>
    %163 = arith.addf %158, %162 : vector<8x64xf32>
    %cst_84 = arith.constant 0.797884583 : f32
    %164 = vector.broadcast %cst_84 : f32 to vector<8x64xf32>
    %165 = arith.mulf %164, %163 : vector<8x64xf32>
    %166 = math.tanh %165 : vector<8x64xf32>
    %cst_85 = arith.constant 1.000000e+00 : f32
    %167 = vector.broadcast %cst_85 : f32 to vector<8x64xf32>
    %168 = arith.addf %167, %166 : vector<8x64xf32>
    %cst_86 = arith.constant 5.000000e-01 : f32
    %169 = vector.broadcast %cst_86 : f32 to vector<8x64xf32>
    %170 = arith.mulf %169, %168 : vector<8x64xf32>
    %171 = arith.mulf %158, %170 : vector<8x64xf32>
    %172 = arith.truncf %171 : vector<8x64xf32> to vector<8x64xbf16>
    %c0_87 = arith.constant 0 : index
    %c0_88 = arith.constant 0 : index
    %c0_89 = arith.constant 0 : index
    %173 = vector.load %arg15[%c0_87, %c0_88, %c0_89] : memref<1x64x32xbf16, #tpu.memory_space<vmem>>, vector<1x64x32xbf16>
    %174 = vector.shape_cast %173 : vector<1x64x32xbf16> to vector<64x32xbf16>
    %cst_90 = arith.constant dense<0.000000e+00> : vector<8x32xf32>
    %175 = tpu.matmul %172, %174, %cst_90 {dimension_numbers = #tpu.dot_dimension_numbers<[1], [0], [0], [1], [0, 0, 1, 1], [], []>} : vector<8x64xbf16>, vector<64x32xbf16>, vector<8x32xf32> -> vector<8x32xf32>
    %c0_91 = arith.constant 0 : index
    %c0_92 = arith.constant 0 : index
    %c0_93 = arith.constant 0 : index
    %176 = vector.load %arg16[%c0_91, %c0_92, %c0_93] : memref<1x1x32xf32, #tpu.memory_space<vmem>>, vector<1x1x32xf32>
    %177 = vector.shape_cast %176 : vector<1x1x32xf32> to vector<1x32xf32>
    %178 = vector.broadcast %177 : vector<1x32xf32> to vector<8x32xf32>
    %179 = arith.addf %175, %178 : vector<8x32xf32>
    %180 = arith.addf %179, %150 : vector<8x32xf32>
    %c0_94 = arith.constant 0 : index
    %c0_95 = arith.constant 0 : index
    %c0_96 = arith.constant 0 : index
    %181 = vector.load %arg17[%c0_94, %c0_95, %c0_96] : memref<1x1x32xf32, #tpu.memory_space<vmem>>, vector<1x1x32xf32>
    %182 = vector.shape_cast %181 : vector<1x1x32xf32> to vector<1x32xf32>
    %c0_97 = arith.constant 0 : index
    %c0_98 = arith.constant 0 : index
    %c0_99 = arith.constant 0 : index
    %183 = vector.load %arg18[%c0_97, %c0_98, %c0_99] : memref<1x1x32xf32, #tpu.memory_space<vmem>>, vector<1x1x32xf32>
    %184 = vector.shape_cast %183 : vector<1x1x32xf32> to vector<1x32xf32>
    %cst_100 = arith.constant dense<0.000000e+00> : vector<8xf32>
    %185 = vector.multi_reduction <add>, %180, %cst_100 [1] : vector<8x32xf32> to vector<8xf32>
    %186 = vector.shape_cast %185 : vector<8xf32> to vector<8x1xf32>
    %cst_101 = arith.constant 3.200000e+01 : f32
    %187 = vector.broadcast %cst_101 : f32 to vector<8x1xf32>
    %188 = arith.divf %186, %187 : vector<8x1xf32>
    %189 = vector.broadcast %188 : vector<8x1xf32> to vector<8x32xf32>
    %190 = arith.subf %180, %189 : vector<8x32xf32>
    %191 = arith.mulf %190, %190 : vector<8x32xf32>
    %cst_102 = arith.constant dense<0.000000e+00> : vector<8xf32>
    %192 = vector.multi_reduction <add>, %191, %cst_102 [1] : vector<8x32xf32> to vector<8xf32>
    %193 = vector.shape_cast %192 : vector<8xf32> to vector<8x1xf32>
    %cst_103 = arith.constant 3.200000e+01 : f32
    %194 = vector.broadcast %cst_103 : f32 to vector<8x1xf32>
    %195 = arith.divf %193, %194 : vector<8x1xf32>
    %196 = vector.broadcast %188 : vector<8x1xf32> to vector<8x32xf32>
    %197 = arith.subf %180, %196 : vector<8x32xf32>
    %cst_104 = arith.constant 9.99999974E-6 : f32
    %198 = vector.broadcast %cst_104 : f32 to vector<8x1xf32>
    %199 = arith.addf %195, %198 : vector<8x1xf32>
    %200 = math.rsqrt %199 : vector<8x1xf32>
    %201 = vector.broadcast %200 : vector<8x1xf32> to vector<8x32xf32>
    %202 = arith.mulf %197, %201 : vector<8x32xf32>
    %203 = vector.broadcast %182 : vector<1x32xf32> to vector<8x32xf32>
    %204 = arith.mulf %202, %203 : vector<8x32xf32>
    %205 = vector.broadcast %184 : vector<1x32xf32> to vector<8x32xf32>
    %206 = arith.addf %204, %205 : vector<8x32xf32>
    %c0_105 = arith.constant 0 : index
    %c0_106 = arith.constant 0 : index
    %207 = vector.load %arg20[%c0_105, %c0_106] : memref<8x32xf32, #tpu.memory_space<vmem>>, vector<8x32xf32>
    tpu.vector_store %arg20[%c0_105, %c0_106], %206 {strides = array<i32>} : memref<8x32xf32, #tpu.memory_space<vmem>>, vector<8x32xf32>,
    %c1_i32 = arith.constant 1 : i32
    %208 = arith.cmpi eq, %arg1, %c1_i32 : i32
    %209 = arith.extui %208 : i1 to i32
    %c0_i32_107 = arith.constant 0 : i32
    %210 = arith.cmpi ne, %209, %c0_i32_107 : i32
    scf.if %210 {
      %c0_108 = arith.constant 0 : index
      %c0_109 = arith.constant 0 : index
      %c0_110 = arith.constant 0 : index
      %211 = vector.load %arg4[%c0_108, %c0_109, %c0_110] : memref<1x8x1xf32, #tpu.memory_space<vmem>>, vector<1x8x1xf32>
      %212 = vector.shape_cast %211 : vector<1x8x1xf32> to vector<8x1xf32>
      %213 = vector.broadcast %212 : vector<8x1xf32> to vector<8x32xf32>
      %214 = arith.mulf %206, %213 : vector<8x32xf32>
      %cst_111 = arith.constant dense<0.000000e+00> : vector<32xf32>
      %215 = vector.multi_reduction <add>, %214, %cst_111 [0] : vector<8x32xf32> to vector<32xf32>
      %216 = vector.shape_cast %215 : vector<32xf32> to vector<1x32xf32>
      %cst_112 = arith.constant dense<0.000000e+00> : vector<1xf32>
      %217 = vector.multi_reduction <add>, %212, %cst_112 [0] : vector<8x1xf32> to vector<1xf32>
      %218 = vector.shape_cast %217 : vector<1xf32> to vector<1x1xf32>
      %cst_113 = arith.constant 1.000000e+00 : f32
      %219 = vector.broadcast %cst_113 : f32 to vector<1x1xf32>
      %220 = arith.maximumf %218, %219 : vector<1x1xf32>
      %221 = vector.broadcast %220 : vector<1x1xf32> to vector<1x32xf32>
      %222 = arith.divf %216, %221 : vector<1x32xf32>
      %c0_114 = arith.constant 0 : index
      %c0_115 = arith.constant 0 : index
      %c0_116 = arith.constant 0 : index
      %223 = vector.load %arg19[%c0_114, %c0_115, %c0_116] : memref<1x1x32xf32, #tpu.memory_space<vmem>>, vector<1x1x32xf32>
      %224 = vector.shape_cast %223 : vector<1x1x32xf32> to vector<1x32xf32>
      %225 = vector.shape_cast %222 : vector<1x32xf32> to vector<1x1x32xf32>
      tpu.vector_store %arg19[%c0_114, %c0_115, %c0_116], %225 {strides = array<i32>} : memref<1x1x32xf32, #tpu.memory_space<vmem>>, vector<1x1x32xf32>,
    } else {
    }
    return
  }
  func.func @transform_0(%arg0: i32, %arg1: i32) -> (i32, i32, i32) {
    %c0_i32 = arith.constant 0 : i32
    %c0_i32_0 = arith.constant 0 : i32
    %c0_i32_1 = arith.constant 0 : i32
    return %arg0, %c0_i32, %c0_i32_0 : i32, i32, i32
  }
  func.func @transform_1(%arg0: i32, %arg1: i32) -> (i32, i32, i32) {
    %c0_i32 = arith.constant 0 : i32
    %c0_i32_0 = arith.constant 0 : i32
    %c0_i32_1 = arith.constant 0 : i32
    return %arg0, %c0_i32, %c0_i32_0 : i32, i32, i32
  }
  func.func @transform_2(%arg0: i32, %arg1: i32) -> (i32, i32, i32) {
    %c0_i32 = arith.constant 0 : i32
    %c0_i32_0 = arith.constant 0 : i32
    %c0_i32_1 = arith.constant 0 : i32
    return %arg0, %c0_i32, %c0_i32_0 : i32, i32, i32
  }
  func.func @transform_3(%arg0: i32, %arg1: i32) -> (i32, i32) {
    %c0_i32 = arith.constant 0 : i32
    %c0_i32_0 = arith.constant 0 : i32
    %c0_i32_1 = arith.constant 0 : i32
    return %c0_i32, %c0_i32_0 : i32, i32
  }
  func.func @transform_4(%arg0: i32, %arg1: i32) -> (i32, i32) {
    %c0_i32 = arith.constant 0 : i32
    %c0_i32_0 = arith.constant 0 : i32
    %c0_i32_1 = arith.constant 0 : i32
    return %c0_i32, %c0_i32_0 : i32, i32
  }
  func.func @transform_5(%arg0: i32, %arg1: i32) -> (i32, i32, i32) {
    %c0_i32 = arith.constant 0 : i32
    %c0_i32_0 = arith.constant 0 : i32
    %c0_i32_1 = arith.constant 0 : i32
    return %arg1, %c0_i32, %c0_i32_0 : i32, i32, i32
  }
  func.func @transform_6(%arg0: i32, %arg1: i32) -> (i32, i32, i32) {
    %c0_i32 = arith.constant 0 : i32
    %c0_i32_0 = arith.constant 0 : i32
    %c0_i32_1 = arith.constant 0 : i32
    return %arg1, %c0_i32, %c0_i32_0 : i32, i32, i32
  }
  func.func @transform_7(%arg0: i32, %arg1: i32) -> (i32, i32, i32) {
    %c0_i32 = arith.constant 0 : i32
    %c0_i32_0 = arith.constant 0 : i32
    %c0_i32_1 = arith.constant 0 : i32
    return %arg1, %c0_i32, %c0_i32_0 : i32, i32, i32
  }
  func.func @transform_8(%arg0: i32, %arg1: i32) -> (i32, i32, i32) {
    %c0_i32 = arith.constant 0 : i32
    %c0_i32_0 = arith.constant 0 : i32
    %c0_i32_1 = arith.constant 0 : i32
    return %arg1, %c0_i32, %c0_i32_0 : i32, i32, i32
  }
  func.func @transform_9(%arg0: i32, %arg1: i32) -> (i32, i32, i32) {
    %c0_i32 = arith.constant 0 : i32
    %c0_i32_0 = arith.constant 0 : i32
    %c0_i32_1 = arith.constant 0 : i32
    return %arg1, %c0_i32, %c0_i32_0 : i32, i32, i32
  }
  func.func @transform_10(%arg0: i32, %arg1: i32) -> (i32, i32, i32) {
    %c0_i32 = arith.constant 0 : i32
    %c0_i32_0 = arith.constant 0 : i32
    %c0_i32_1 = arith.constant 0 : i32
    return %arg1, %c0_i32, %c0_i32_0 : i32, i32, i32
  }
  func.func @transform_11(%arg0: i32, %arg1: i32) -> (i32, i32, i32) {
    %c0_i32 = arith.constant 0 : i32
    %c0_i32_0 = arith.constant 0 : i32
    %c0_i32_1 = arith.constant 0 : i32
    return %arg1, %c0_i32, %c0_i32_0 : i32, i32, i32
  }
  func.func @transform_12(%arg0: i32, %arg1: i32) -> (i32, i32, i32) {
    %c0_i32 = arith.constant 0 : i32
    %c0_i32_0 = arith.constant 0 : i32
    %c0_i32_1 = arith.constant 0 : i32
    return %arg1, %c0_i32, %c0_i32_0 : i32, i32, i32
  }
  func.func @transform_13(%arg0: i32, %arg1: i32) -> (i32, i32, i32) {
    %c0_i32 = arith.constant 0 : i32
    %c0_i32_0 = arith.constant 0 : i32
    %c0_i32_1 = arith.constant 0 : i32
    return %arg1, %c0_i32, %c0_i32_0 : i32, i32, i32
  }
  func.func @transform_14(%arg0: i32, %arg1: i32) -> (i32, i32, i32) {
    %c0_i32 = arith.constant 0 : i32
    %c0_i32_0 = arith.constant 0 : i32
    %c0_i32_1 = arith.constant 0 : i32
    return %arg1, %c0_i32, %c0_i32_0 : i32, i32, i32
  }
  func.func @transform_15(%arg0: i32, %arg1: i32) -> (i32, i32, i32) {
    %c0_i32 = arith.constant 0 : i32
    %c0_i32_0 = arith.constant 0 : i32
    %c0_i32_1 = arith.constant 0 : i32
    return %arg1, %c0_i32, %c0_i32_0 : i32, i32, i32
  }
  func.func @transform_16(%arg0: i32, %arg1: i32) -> (i32, i32, i32) {
    %c0_i32 = arith.constant 0 : i32
    %c0_i32_0 = arith.constant 0 : i32
    %c0_i32_1 = arith.constant 0 : i32
    return %arg1, %c0_i32, %c0_i32_0 : i32, i32, i32
  }
  func.func @transform_17(%arg0: i32, %arg1: i32) -> (i32, i32, i32) {
    %c0_i32 = arith.constant 0 : i32
    %c0_i32_0 = arith.constant 0 : i32
    %c0_i32_1 = arith.constant 0 : i32
    return %arg0, %c0_i32, %c0_i32_0 : i32, i32, i32
  }
}

</mosaic_0001>

<bundles_post_ra>
// kernel: vhhbert_forward.1
= control target key start
LH: loop header
LB: loop body
LE: loop exit
PB: predicated region body
PF: predicated region fallthrough
CT: control target
= control target key end

     0   :  { %s2786_s0 = inlined_call_operand.vmem [shape: f32[2,8,32], index: 0, kind: input, shape index: {}]   ;;  %s2787_s1 = inlined_call_operand.vmem [shape: f32[2,1,8], index: 1, kind: input, shape index: {}]   ;;  %s2788_s2 = inlined_call_operand.vmem [shape: f32[2,8,1], index: 2, kind: input, shape index: {}]   ;;  %s2789_s3 = inlined_call_operand.vmem [shape: f32[1,32], index: 3, kind: input, shape index: {}]   ;;  %s2790_s4 = inlined_call_operand.vmem [shape: f32[1,32], index: 4, kind: input, shape index: {}]   ;;  %s2791_s5 = inlined_call_operand.vmem [shape: bf16[2,32,96], index: 5, kind: input, shape index: {}]   ;;  %s2792_s6 = inlined_call_operand.vmem [shape: f32[2,1,96], index: 6, kind: input, shape index: {}]   ;;  %s2793_s7 = inlined_call_operand.vmem [shape: bf16[2,32,32], index: 7, kind: input, shape index: {}]   ;;  %s2794_s8 = inlined_call_operand.vmem [shape: f32[2,1,32], index: 8, kind: input, shape index: {}]   ;;  %s2795_s9 = inlined_call_operand.vmem [shape: f32[2,1,32], index: 9, kind: input, shape index: {}]   ;;  %s2796_s10 = inlined_call_operand.vmem [shape: f32[2,1,32], index: 10, kind: input, shape index: {}]   ;;  %s2797_s11 = inlined_call_operand.vmem [shape: bf16[2,32,64], index: 11, kind: input, shape index: {}]   ;;  %s2798_s12 = inlined_call_operand.vmem [shape: f32[2,1,64], index: 12, kind: input, shape index: {}]   ;;  %s2799_s13 = inlined_call_operand.vmem [shape: bf16[2,64,32], index: 13, kind: input, shape index: {}]   ;;  %s2800_s14 = inlined_call_operand.vmem [shape: f32[2,1,32], index: 14, kind: input, shape index: {}]   ;;  %s2801_s15 = inlined_call_operand.vmem [shape: f32[2,1,32], index: 15, kind: input, shape index: {}]   ;;  %s2802_s16 = inlined_call_operand.vmem [shape: f32[2,1,32], index: 16, kind: input, shape index: {}]   ;;  %s2803_s17 = inlined_call_operand.hbm [shape: f32[2,1,32], index: 17, kind: output, shape index: {}]  }
   0x1   :  { %2817 = sst [smem:[#allocation21_spill]] %s2786_s0 }
   0x2   :  { %2818 = sst [smem:[#allocation22_spill]] %s2787_s1 }
   0x3   :  { %2819 = sst [smem:[#allocation23_spill]] %s2788_s2 }
   0x4   :  { %2820 = sst [smem:[#allocation24_spill]] %s2789_s3 }
   0x5   :  { %2821 = sst [smem:[#allocation25_spill]] %s2790_s4 }
   0x6   :  { %2822 = sst [smem:[#allocation26_spill]] %s2791_s5 }
   0x7   :  { %2823 = sst [smem:[#allocation27_spill]] %s2793_s7 }
   0x8   :  { %2824 = sst [smem:[#allocation28_spill]] %s2796_s10 }
   0x9   :  { %2825 = sst [smem:[#allocation29_spill]] %s2797_s11 }
   0xa   :  { %2826 = sst [smem:[#allocation30_spill]] %s2801_s15 }
   0xb   :  { %2827 = sst [smem:[#allocation31_spill]] %s2802_s16 }
   0xc   :  { %2828 = sst [smem:[#allocation32_spill]] %s2803_s17 }
   0xd   :  { %22 = vsyncpa [#allocation6], 0 }
   0xe   :  { %24 = vsyncpa [#allocation6 + $0x1], 0  ;;  %s2420_s24 = smov 0   ;;  %s2422_s25 = smov 0  }
   0xf   :  { %s2424_s26 = smov 0   ;;  %s2426_s27 = smov 0  }
  0x10   :  { %s2428_s28 = smov 0   ;;  %s2430_s29 = smov 0  }
  0x11   :  { %s2432_s0 = smov 0   ;;  %s2434_s30 = smov 0  }
  0x12 LB: > { %2829 = sst [smem:[#allocation8_spill]] %s2282_s24  ;;  %s1921_s18 = sadd.s32 4294967295, %s2310_s30   ;;  %s2310_s30 = sphi %s2434_s30, %s30_s30   ;;  %s2306_s0 = sphi %s2432_s0, %s2881_s0   ;;  %s2302_s29 = sphi %s2430_s29, %s2880_s29   ;;  %s2298_s28 = sphi %s2428_s28, %s2879_s28   ;;  %s2294_s27 = sphi %s2426_s27, %s2878_s27   ;;  %s2290_s26 = sphi %s2424_s26, %s2877_s26   ;;  %s2286_s25 = sphi %s2422_s25, %s2883_s25   ;;  %s2282_s24 = sphi %s2420_s24, %s2882_s24  }
  0x13   : > { %2830 = sst [smem:[#allocation9_spill]] %s2290_s26  ;;  %s1922_s19 = sadd.s32 4294967294, %s2310_s30  }
  0x14   : > { %2831 = sst [smem:[#allocation10_spill]] %s2294_s27  ;;  %s39_s1 = sadd.s32 1, %s2302_s29 }
  0x15   : > { %2832 = sst [smem:[#allocation11_spill]] %s2298_s28  ;;  %p40_p0 = scmp.ge.s32.totalorder %s39_s1, 2 }
  0x16   : > { %2833 = sst [smem:[#allocation12_spill]] %s2302_s29  ;;  %s42_s20 = sadd.s32 1, %s2306_s0 }
  0x17   : > { %2834 = sst [smem:[#allocation13_spill]] %s2306_s0  ;;  %p491_p1 = scmp.ne.s32.totalorder %s2290_s26, %s2286_s25 }
  0x18   : > { %2835 = sst [smem:[#allocation14_spill]] %s2310_s30  ;;  %p492_p2 = scmp.eq.s32.totalorder %s1921_s18, 3 }
  0x19   : > { %s2885_s1 = smov (%p40_p0, %s39_s1), 0  ;;  %s2887_s20 = smov (!%p40_p0, %s42_s20), %s2306_s0 }
  0x1a   : > { %2836 = sst [smem:[#allocation15_spill]] %s2885_s1  ;;  %p2469_p3 = por %p492_p2, %p491_p1 }
  0x1b   : > { %p497_p4 = scmp.ne.s32.totalorder %s2286_s25, %s2282_s24  ;;  %p44_p5 = scmp.ge.s32.totalorder %s2887_s20, 2 }
  0x1c   : > { %s2837_s21 = scalar_select %p2469_p3, 1, 0 }
  0x1d   : > { %p498_p6 = scmp.eq.s32.totalorder %s1922_s19, 3  ;;  %p1925_p7 = scmp.ge.s32.totalorder %s2310_s30, 1 }
  0x1e   : > { %2838 = sst [smem:[#allocation16_spill]] %s2837_s21  ;;  %p622_p8 = scmp.lt.s32.totalorder %s2310_s30, 5 }
  0x1f   : > { %s2889_s20 = smov (%p44_p5, %s2887_s20), 0  ;;  %p2479_p9 = por %p498_p6, %p497_p4 }
  0x20   : > { %2839 = sst [smem:[#allocation17_spill]] %s2889_s20  ;;  %p623_p10 = pnand %p1925_p7, %p622_p8 }
  0x21   : > { %s2840_s22 = scalar_select %p2479_p9, 1, 0 }
  0x22   : > { %s478_s23 = ssub.s32 %s2306_s0, %s2889_s20  ;;  %s481_s18 = sadd.s32 1, %s2290_s26 }
  0x23   : > { %2841 = sst [smem:[#allocation18_spill]] %s2840_s22  ;;  %p479_p11 = scmp.eq.s32.totalorder %s478_s23, 0 }
  0x24   : > { %626 = sbr.rel (%p623_p10) target bundleno = 3013 (0xbc5), region = 88 }
  0x25   : > { %s2487_s1 = scalar_select %p479_p11, %s2290_s26, %s481_s18  }
  0x27   : > { %2842 = sst [smem:[#allocation19_spill]] %s2487_s1 }
  0x2b   : > { %p723_p12 = scmp.lt.s32.totalorder %s2298_s28, 1  ;;  %p734_p13 = scmp.lt.s32.totalorder %s2294_s27, 1 }
  0x2c   : > { %s2844_s24 = sld [smem:[#allocation21_spill]]  ;;  %s2845_s2 = sld [smem:[#allocation23_spill]] }
  0x2d   : > { %s2493_s29 = scalar_select %p723_p12, %s2298_s28, 1 }
  0x2e   : > { %s2496_s22 = scalar_select %p734_p13, %s2294_s27, 1 }
  0x2f   : > { %s1926_s23 = sshll.u32 %s2493_s29, 3  ;;  %s2847_s5 = sld [smem:[#allocation26_spill]] }
  0x30   : > { %s1973_s4 = sshll.u32 %s2496_s22, 4  ;;  %s2848_s7 = sld [smem:[#allocation27_spill]] }
  0x31   : > { %s2850_s11 = sld [smem:[#allocation29_spill]]  ;;  %s771_s3 = scalar_lea.vmem %s2800_s14, %s2496_s22 }
  0x32   : > { %s726_s30 = scalar_lea.vmem %s2844_s24, %s1926_s23  ;;  %s2509_s28 = scalar_lea.vmem %s2845_s2, %s1926_s23 }
  0x33   : > { %2846 = sst [smem:[#allocation20_spill]] %s2509_s28  ;;  %s1976_s28 = sshll.u32 %s2496_s22, 5 }
  0x34   : > { %s2551_s21 = scalar_lea.vmem %s2799_s13, %s1976_s28  ;;  %s2851_s2 = sld [smem:[#allocation30_spill]] }
  0x35   : > { %s2519_s19 = scalar_lea.vmem %s2847_s5, %s1973_s4  ;;  %s2853_s18 = sand.u32 1, %s2286_s25  }
  0x36   : > { %s2524_s24 = scalar_lea.vmem %s2848_s7, %s1973_s4  ;;  %s2567_s26 = scalar_lea.vmem [#allocation5], %s2853_s18 }
  0x37   : > { %s2541_s5 = scalar_lea.vmem %s2850_s11, %s1973_s4  ;;  %s2852_s11 = sld [smem:[#allocation31_spill]] }
  0x38   : > { %s2854_s7 = sld [smem:[#allocation10_spill]] }
  0x3a   : > { %s774_s15 = scalar_lea.vmem %s2851_s2, %s2496_s22 }
  0x3d   : > { %s777_s10 = scalar_lea.vmem %s2852_s11, %s2496_s22 }
  0x3e   : > { %p1936_p0 = scmp.ne.s32.totalorder %s2854_s7, 0 }
  0x3f   : > { %v783_v0 = vld [vmem:[%s726_s30] sm:$0xff] (!%p1936_p0)  ;;  %vm786_vm0 = vcmask (!%p1936_p0), 261120   ;;  %s2855_s11 = sld [smem:[#allocation24_spill]] (!%p1936_p0)  ;;  %s2856_s30 = sld [smem:[#allocation25_spill]] (!%p1936_p0) }
  0x40   : > { %782 = sbr.rel (%p1936_p0) target bundleno = 378 (0x17a), region = 92  ;;  %v787_v1 = vsel (!%p1936_p0), %vm786_vm0, %v783_v0, 0.0 }
  0x41   : > { %788 = vadd.xlane.f32.xlu0 (!%p1936_p0), %v787_v1 }
  0x45   : > { %v1937_v11 = vld [vmem:[%s2855_s11] ss:$0 sm:$0xff] (!%p1936_p0) }
  0x46   : > { %v1938_v13 = vld [vmem:[%s2856_s30] ss:$0 sm:$0xff] (!%p1936_p0) }
  0xce   : > { %v789_v2 = vpop.xlane.xlu0 %788 }
  0xcf   : > { %v791_v3 = vmul.f32 0.03125, %v789_v2 }
  0xd1   : > { %v792_v4 = vsub.f32 %v783_v0, %v791_v3 }
  0xd3   : > { %v793_v5 = vmul.f32 %v792_v4, %v792_v4 }
  0xd5   : > { %v794_v6 = vsel %vm786_vm0, %v793_v5, 0.0 }
  0xd6   : > { %795 = vadd.xlane.f32.xlu0 %v794_v6 }
 0x163   : > { %v796_v7 = vpop.xlane.xlu0 %795 }
 0x164   : > { %v797_v8 = vmul.f32 0.03125, %v796_v7 }
 0x166   : > { %v798_v9 = vadd.f32 1e-05, %v797_v8 }
 0x168   : > { %2179 = vrsqrt.f32 %v798_v9 }
 0x172   : > { %v2180_v10 = vpop.eup %2179 }
 0x173   : > { %v800_v12 = vmul.f32 %v2180_v10, %v792_v4 }
 0x175   : > { %v807_v14 = vmul.f32 %v1937_v11, %v800_v12 }
 0x177   : > { %v814_v15 = vadd.f32 %v1938_v13, %v807_v14 }
 0x179   : > { %815 = vst.msk [vmem:[#allocation2] sm:$0xff] %vm786_vm0, %v814_v15 }
 0x17a PF: > { %v2181_v16 = vld [vmem:[%s2519_s19] sm:$0xff]   ;;  %v2312_v17 = vmov 0.0   ;;  %v2182_v18 = vld [vmem:[%s2519_s19 + $0x8] sm:$0xff]   ;;  %vm2313_vm1 = vmmov 0   ;;  %vm841_vm2 = vcmask 261120   ;;  %s2857_s17 = scalar_lea.vmem %s2792_s6, %s2496_s22  ;;  %vm885_vm3 = vcmask 785408  }
 0x17b   : > { %2007 = vmatprep.subr.bf16.mxu0 %v2312_v17  ;;  %2015 = vmatprep.subr.bf16.mxu1 %v2312_v17  ;;  %v1939_v21 = vld [vmem:[%s2857_s17] ss:$0 sm:$0xff]  ;;  %s2314_s0 = smov 120   ;;  %s2315_s23 = smov 96   ;;  %vm895_vm4 = vcmask 64512   ;;  %v944_v40 = vlaneseq  ;;  %vm967_vm5 = vcmask 1043456  }
 0x17c   : > { %2008 = vmatpush3.bf16.msra.mxu0 %v2181_v16  ;;  %2011 = vmatprep.mubr.msk.bf16.mxu0 %vm2313_vm1, %v2312_v17  ;;  %s2316_s27 = smov 80   ;;  %s2317_s4 = smov 88   ;;  %vm1131_vm6 = vcmask 130112   ;;  %vm1252_vm7 = vcmask 195712   ;;  %vm1373_vm8 = vcmask 261312   ;;  %vm1590_vm9 = vcmask 523264  }
 0x17d   : > { %2009 = vmatprep.subr.bf16.mxu0 %v2312_v17  ;;  %2017 = vmatprep.mubr.msk.bf16.mxu1 %vm2313_vm1, %v2312_v17  ;;  %s2318_s20 = smov 72   ;;  %s2319_s18 = smov 112   ;;  %v945_v43 = vshrl.u32 %v944_v40, 7 }
 0x17e   : > { %s2320_s2 = smov 104   ;;  %s2858_s16 = sld [smem:[#allocation22_spill]] }
 0x17f   : > { %v946_v45 = vsub.s32 0, %v945_v43  ;;  %s2322_s30 = smov 64   ;;  %s2323_s19 = smov 40  }
 0x180   : > { %v2585_v19 = vld [vmem:[#allocation2] sm:$0xff]  ;;  %2010 = vmatpush3.bf16.msra.mxu0 %v2182_v18  ;;  %s2324_s1 = smov 48   ;;  %s2325_s17 = smov 8  }
 0x181   : > { %v817_v20 = vpack.c.bf16 %v2585_v19, %v2585_v19  ;;  %2021 = vmatprep.subr.bf16.mxu0 %v2312_v17 }
 0x183   : > { %2012 = vmatmul.mubr.msk.bf16.vlgmr.msra.gmra.mrb[0].mxu0 %vm841_vm2, %v817_v20 }
 0x184   : > { %2023 = vmatprep.mubr.msk.bf16.mxu0 %vm2313_vm1, %v2312_v17  ;;  %s2859_s28 = scalar_lea.vmem %s2858_s16, %s2493_s29  ;;  %s2321_s29 = smov 56  }
 0x185   : > { %v887_v41 = vld [vmem:[%s2859_s28] sm:$0x1]  ;;  %s2862_s16 = sld [smem:[#allocation28_spill]] }
 0x186   : > { %v888_v42 = vsub.f32 1.0, %v887_v41 }
 0x188   : > { %v889_v44 = vmul.f32 -1e+09, %v888_v42 }
 0x18a   : > { %v947_v46 = vrot.slane %v889_v44, %v946_v45 }
 0x18b   : > { %s2863_s28 = scalar_lea.vmem %s2862_s16, %s2496_s22 }
 0x256   : > { %v879_v22 = vpop.f32.mrb[0].mxu0 }
 0x257   : > { %v880_v23 = vadd.f32 %v1939_v21, %v879_v22  ;;  %v2013_v24 = vpop.f32.mrb[1].mxu0 }
 0x258   : > { %v882_v25 = vpop.f32.mrb[2].mxu0 }
 0x259   : > { %886 = vst.msk [vmem:[#allocation3] sm:$0xff] %vm885_vm3, %v880_v23  ;;  %v2014_v26 = vpop.f32.mrb[3].mxu0 }
 0x260   : > { %v1012_v27 = vld [vmem:[#allocation3] sm:$0xff] }
 0x261   : > { %v2601_v28 = vpack.c.bf16 %v1012_v27, %v1012_v27 }
 0x263   : > { %1015 = vrot.lane.b32.xlu1 %v2601_v28, %s2314_s0  ;;  %893 = vrot.lane.b32.xlu0 %v2601_v28, %s2315_s23  ;;  %s2326_s0 = smov 16   ;;  %s2327_s23 = smov 24  }
 0x267   : > { %1138 = vrot.lane.b32.xlu1 %v2601_v28, %s2316_s27  ;;  %1017 = vrot.lane.b32.xlu0 %v2601_v28, %s2317_s4  ;;  %s2860_s4 = scalar_lea.vmem %s2794_s8, %s2496_s22  ;;  %s2867_s27 = sld [smem:[#allocation10_spill]] }
 0x26b   : > { %1259 = vrot.lane.b32.xlu1 %v2601_v28, %s2318_s20  ;;  %1136 = vrot.lane.b32.xlu0 %v2601_v28, %s2319_s18 }
 0x26d   : > { %p1969_p1 = scmp.ne.s32.totalorder %s2867_s27, 1 }
 0x26e   : > { %vm1683_vm10 = vcmask (!%p1969_p1), 7168   ;;  %vm1699_vm11 = vcmask (!%p1969_p1), 253952  }
 0x26f   : > { %1257 = vrot.lane.b32.xlu0 %v2601_v28, %s2320_s2  ;;  %s2861_s2 = scalar_lea.vmem %s2795_s9, %s2496_s22 }
 0x2d5   : > { %v894_v29 = vpop.permute.xlu0 %893  ;;  %v1016_v32 = vpop.permute.xlu1 %1015 }
 0x2d6   : > { %v900_v30 = vsel %vm895_vm4, %v894_v29, 0 }
 0x2d7   : > { %2016 = vmatpush3.bf16.xpose.msra.mxu1 %v900_v30 }
 0x2d8   : > { %2027 = vmatprep.subr.bf16.mxu1 %v2312_v17 }
 0x2d9   : > { %v1018_v31 = vpop.permute.xlu0 %1017  ;;  %v1139_v34 = vpop.permute.xlu1 %1138 }
 0x2da   : > { %v1023_v33 = vsel %vm895_vm4, %v1018_v31, 0  ;;  %v1144_v35 = vsel %vm895_vm4, %v1139_v34, 0 }
 0x2dd   : > { %v1260_v36 = vpop.permute.xlu1 %1259  ;;  %v1137_v37 = vpop.permute.xlu0 %1136 }
 0x2de   : > { %2018 = vmatmul.mubr.msk.bf16.vlgmr.msra.gmra.mrb[0].mxu1 %vm895_vm4, %v2601_v28  ;;  %v1265_v38 = vsel %vm895_vm4, %v1260_v36, 0 }
 0x2df   : > { %2028 = vmatpush3.bf16.xpose.msra.mxu1 %v1023_v33  ;;  %2029 = vmatprep.mubr.msk.bf16.mxu1 %vm2313_vm1, %v2312_v17 }
 0x2e0   : > { %2039 = vmatprep.subr.bf16.mxu1 %v2312_v17 }
 0x2e1   : > { %v1258_v39 = vpop.permute.xlu0 %1257 }
 0x2e6   : > { %2030 = vmatmul.mubr.msk.bf16.vlgmr.msra.gmra.mrb[4].mxu1 %vm895_vm4, %v1016_v32 }
 0x2e7   : > { %2040 = vmatpush3.bf16.xpose.msra.mxu1 %v1144_v35  ;;  %2041 = vmatprep.mubr.msk.bf16.mxu1 %vm2313_vm1, %v2312_v17 }
 0x2e8   : > { %2051 = vmatprep.subr.bf16.mxu1 %v2312_v17 }
 0x2ee   : > { %2042 = vmatmul.mubr.msk.bf16.vlgmr.msra.gmra.mrb[8].mxu1 %vm895_vm4, %v1137_v37 }
 0x2ef   : > { %2052 = vmatpush3.bf16.xpose.msra.mxu1 %v1265_v38  ;;  %2053 = vmatprep.mubr.msk.bf16.mxu1 %vm2313_vm1, %v2312_v17 }
 0x2f0   : > { %2063 = vmatprep.subr.bf16.mxu1 %v2312_v17 }
 0x2f6   : > { %2054 = vmatmul.mubr.msk.bf16.vlgmr.msra.gmra.mrb[12].mxu1 %vm895_vm4, %v1258_v39 }
 0x2f7   : > { %2067 = vmatprep.mubr.msk.bf16.mxu1 %vm2313_vm1, %v2312_v17 }
 0x3b1   : > { %v936_v47 = vpop.f32.mrb[0].mxu1 }
 0x3b2   : > { %v942_v48 = vmul.f32 0.35355338, %v936_v47  ;;  %v2019_v49 = vpop.f32.mrb[1].mxu1 }
 0x3b3   : > { %v939_v50 = vpop.f32.mrb[2].mxu1 }
 0x3b4   : > { %v2020_v51 = vpop.f32.mrb[3].mxu1  ;;  %v949_v52 = vadd.f32 %v947_v46, %v942_v48 }
 0x3b6   : > { %v950_v53 = vsel %vm895_vm4, %v949_v52, -inf }
 0x3b7   : > { %951 = vmax.xlane.f32.xlu1 %v950_v53 }
 0x3b9   : > { %v1059_v54 = vpop.f32.mrb[4].mxu1 }
 0x3ba   : > { %v1065_v55 = vmul.f32 0.35355338, %v1059_v54  ;;  %v2031_v56 = vpop.f32.mrb[5].mxu1 }
 0x3bb   : > { %v1062_v57 = vpop.f32.mrb[6].mxu1 }
 0x3bc   : > { %v2032_v58 = vpop.f32.mrb[7].mxu1  ;;  %v1066_v59 = vadd.f32 %v1065_v55, %v947_v46 }
 0x3be   : > { %v1067_v60 = vsel %vm895_vm4, %v1066_v59, -inf }
 0x3bf   : > { %1068 = vmax.xlane.f32.xlu0 %v1067_v60 }
 0x3c1   : > { %v1180_v61 = vpop.f32.mrb[8].mxu1 }
 0x3c2   : > { %v1186_v62 = vmul.f32 0.35355338, %v1180_v61  ;;  %v2043_v63 = vpop.f32.mrb[9].mxu1 }
 0x3c3   : > { %v1183_v0 = vpop.f32.mrb[10].mxu1 }
 0x3c4   : > { %v2044_v1 = vpop.f32.mrb[11].mxu1  ;;  %v1187_v2 = vadd.f32 %v1186_v62, %v947_v46 }
 0x3c5   : > { %v2183_v1 = vld [vmem:[%s2524_s24] sm:$0xff]  }
 0x3c6   : > { %v1188_v3 = vsel %vm895_vm4, %v1187_v2, -inf  ;;  %2064 = vmatpush3.bf16.msra.mxu1 %v2183_v1 }
 0x3c7   : > { %1189 = vmax.xlane.f32.xlu0 %v1188_v3  ;;  %2065 = vmatprep.subr.bf16.mxu1 %v2312_v17 }
 0x3c9   : > { %v1301_v4 = vpop.f32.mrb[12].mxu1 }
 0x3ca   : > { %v1307_v5 = vmul.f32 0.35355338, %v1301_v4  ;;  %v2055_v6 = vpop.f32.mrb[13].mxu1 }
 0x3cb   : > { %v1304_v7 = vpop.f32.mrb[14].mxu1 }
 0x3cc   : > { %v2056_v8 = vpop.f32.mrb[15].mxu1  ;;  %v1308_v9 = vadd.f32 %v1307_v5, %v947_v46 }
 0x3ce   : > { %v1309_v10 = vsel %vm895_vm4, %v1308_v9, -inf }
 0x3cf   : > { %1310 = vmax.xlane.f32.xlu1 %v1309_v10 }
 0x444   : > { %v952_v11 = vpop.xlane.xlu1 %951 }
 0x445   : > { %v953_v12 = vsub.f32 %v949_v52, %v952_v11 }
 0x447   : > { %v954_v13 = vmul.f32 1.442695, %v953_v12 }
 0x449   : > { %2191 = vpow2.f32 %v954_v13 }
 0x44c   : > { %v1069_v14 = vpop.xlane.xlu0 %1068 }
 0x44d   : > { %v1070_v15 = vsub.f32 %v1066_v59, %v1069_v14 }
 0x44f   : > { %v1071_v16 = vmul.f32 1.442695, %v1070_v15 }
 0x451   : > { %2193 = vpow2.f32 %v1071_v16  ;;  %v1951_v16 = vld [vmem:[%s2860_s4] ss:$0 sm:$0xff]  ;;  %s2868_s4 = sld [smem:[#allocation20_spill]] (!%p1969_p1) }
 0x453   : > { %v2192_v18 = vpop.eup %2191 }
 0x454   : > { %v1190_v20 = vpop.xlane.xlu0 %1189  ;;  %v956_v21 = vsel %vm895_vm4, %v2192_v18, 0.0 }
 0x455   : > { %v1191_v22 = vsub.f32 %v1187_v2, %v1190_v20  ;;  %957 = vadd.xlane.f32.xlu0 %v956_v21  ;;  %v2184_v2 = vld [vmem:[%s2524_s24 + $0x8] sm:$0xff]  }
 0x456   : > { %2066 = vmatpush3.bf16.msra.mxu1 %v2184_v2 }
 0x457   : > { %v1192_v23 = vmul.f32 1.442695, %v1191_v22  ;;  %2079 = vmatprep.subr.bf16.mxu1 %v2312_v17 }
 0x459   : > { %2195 = vpow2.f32 %v1192_v23 }
 0x45b   : > { %v2194_v24 = vpop.eup %2193 }
 0x45c   : > { %v1073_v25 = vsel %vm895_vm4, %v2194_v24, 0.0  ;;  %v1311_v29 = vpop.xlane.xlu1 %1310 }
 0x45d   : > { %1074 = vadd.xlane.f32.xlu1 %v1073_v25  ;;  %v1312_v30 = vsub.f32 %v1308_v9, %v1311_v29 }
 0x45f   : > { %v1313_v31 = vmul.f32 1.442695, %v1312_v30 }
 0x461   : > { %2197 = vpow2.f32 %v1313_v31 }
 0x463   : > { %v2196_v26 = vpop.eup %2195 }
 0x464   : > { %v1194_v27 = vsel %vm895_vm4, %v2196_v26, 0.0 }
 0x465   : > { %1195 = vadd.xlane.f32.xlu0 %v1194_v27 }
 0x46b   : > { %v2198_v32 = vpop.eup %2197 }
 0x46c   : > { %v1315_v33 = vsel %vm895_vm4, %v2198_v32, 0.0 }
 0x46e   : > { %1079 = vrot.lane.b32.xlu1 %v2601_v28, %s2321_s29 }
 0x47b   : > { %962 = vrot.lane.b32.xlu0 %v2601_v28, %s2322_s30  ;;  %s2864_s30 = scalar_lea.vmem %s2798_s12, %s2496_s22 }
 0x47f   : > { %1321 = vrot.lane.b32.xlu0 %v2601_v28, %s2323_s19 }
 0x492   : > { %1316 = vadd.xlane.f32.xlu1 %v1315_v33  ;;  %v2186_v33 = vld [vmem:[%s2541_s5 + $0x8] sm:$0xff]  }
 0x4a3   : > { %1200 = vrot.lane.b32.xlu1 %v2601_v28, %s2324_s1 }
 0x4e2   : > { %v958_v34 = vpop.xlane.xlu0 %957 }
 0x4e3   : > { %2199 = vrcp.f32 %v958_v34 }
 0x4ea   : > { %v1075_v35 = vpop.xlane.xlu1 %1074 }
 0x4eb   : > { %2201 = vrcp.f32 %v1075_v35 }
 0x4ed   : > { %v2200_v36 = vpop.eup %2199 }
 0x4ee   : > { %v960_v38 = vmul.f32 %v2200_v36, %v2192_v18  ;;  %v1080_v41 = vpop.permute.xlu1 %1079 }
 0x4ef   : > { %v1085_v44 = vsel %vm967_vm5, %v1080_v41, 0 }
 0x4f0   : > { %v961_v42 = vpack.c.bf16 %v960_v38, %v960_v38 }
 0x4f2   : > { %v1196_v37 = vpop.xlane.xlu0 %1195 }
 0x4f3   : > { %2203 = vrcp.f32 %v1196_v37  ;;  %v1955_v37 = vld [vmem:[%s2861_s2] ss:$0 sm:$0xff] }
 0x4f5   : > { %v2202_v43 = vpop.eup %2201 }
 0x4f6   : > { %v963_v39 = vpop.permute.xlu0 %962  ;;  %v1077_v28 = vmul.f32 %v2202_v43, %v2194_v24  ;;  %v2187_v43 = vld [vmem:[%s2551_s21] sm:$0xff]  }
 0x4f7   : > { %v969_v40 = vsel %vm967_vm5, %v963_v39, 0  ;;  %v1956_v39 = vld [vmem:[%s2863_s28] ss:$0 sm:$0xff] }
 0x4f8   : > { %2022 = vmatpush3.bf16.msra.mxu0 %v969_v40  ;;  %v1078_v45 = vpack.c.bf16 %v1077_v28, %v1077_v28  ;;  %v2189_v28 = vld [vmem:[%s2551_s21 + $0x10] sm:$0xff]  }
 0x4f9   : > { %2033 = vmatprep.subr.bf16.mxu0 %v2312_v17 }
 0x4fa   : > { %v1322_v51 = vpop.permute.xlu0 %1321 }
 0x4fb   : > { %2024 = vmatmul.mubr.msk.bf16.vlgmr.msra.gmra.mrb[4].mxu0 %vm895_vm4, %v961_v42  ;;  %v1327_v53 = vsel %vm967_vm5, %v1322_v51, 0 }
 0x4fc   : > { %2034 = vmatpush3.bf16.msra.mxu0 %v1085_v44  ;;  %2035 = vmatprep.mubr.msk.bf16.mxu0 %vm2313_vm1, %v2312_v17  ;;  %v2188_v44 = vld [vmem:[%s2551_s21 + $0x8] sm:$0xff]  }
 0x4fd   : > { %2045 = vmatprep.subr.bf16.mxu0 %v2312_v17  ;;  %v2204_v46 = vpop.eup %2203 }
 0x4fe   : > { %v1198_v48 = vmul.f32 %v2204_v46, %v2196_v26  ;;  %v1957_v46 = vld [vmem:[%s2864_s30] ss:$0 sm:$0xff] }
 0x500   : > { %v1199_v52 = vpack.c.bf16 %v1198_v48, %v1198_v48 }
 0x503   : > { %2036 = vmatmul.mubr.msk.bf16.vlgmr.msra.gmra.mrb[8].mxu0 %vm895_vm4, %v1078_v45  ;;  %v2190_v45 = vld [vmem:[%s2551_s21 + $0x18] sm:$0xff]  }
 0x504   : > { %2047 = vmatprep.mubr.msk.bf16.mxu0 %vm2313_vm1, %v2312_v17 }
 0x51f   : > { %v1317_v47 = vpop.xlane.xlu1 %1316 }
 0x520   : > { %2205 = vrcp.f32 %v1317_v47 }
 0x523   : > { %v1201_v49 = vpop.permute.xlu1 %1200 }
 0x524   : > { %v1206_v50 = vsel %vm967_vm5, %v1201_v49, 0 }
 0x525   : > { %2046 = vmatpush3.bf16.msra.mxu0 %v1206_v50 }
 0x526   : > { %2057 = vmatprep.subr.bf16.mxu0 %v2312_v17 }
 0x528   : > { %2048 = vmatmul.mubr.msk.bf16.vlgmr.msra.gmra.mrb[12].mxu0 %vm895_vm4, %v1199_v52 }
 0x529   : > { %2058 = vmatpush3.bf16.msra.mxu0 %v1327_v53  ;;  %2059 = vmatprep.mubr.msk.bf16.mxu0 %vm2313_vm1, %v2312_v17 }
 0x52a   : > { %v2206_v54 = vpop.eup %2205  ;;  %2071 = vmatprep.subr.bf16.mxu0 %v2312_v17 }
 0x52b   : > { %v1319_v55 = vmul.f32 %v2206_v54, %v2198_v32  ;;  %v2185_v32 = vld [vmem:[%s2541_s5] sm:$0xff]  }
 0x52d   : > { %v1320_v56 = vpack.c.bf16 %v1319_v55, %v1319_v55 }
 0x530   : > { %2060 = vmatmul.mubr.msk.bf16.vlgmr.msra.gmra.mrb[16].mxu0 %vm895_vm4, %v1320_v56 }
 0x531   : > { %2075 = vmatprep.mubr.msk.bf16.mxu0 %vm2313_vm1, %v2312_v17  ;;  %2072 = vmatpush3.bf16.msra.mxu0 %v2185_v32 }
 0x532   : > { %2073 = vmatprep.subr.bf16.mxu0 %v2312_v17 }
 0x535   : > { %2074 = vmatpush3.bf16.msra.mxu0 %v2186_v33 }
 0x5ce   : > { %v1005_v57 = vpop.f32.mrb[4].mxu0 }
 0x5cf   : > { %1011 = vst.msk [vmem:[#allocation4] sm:$0xff] %vm895_vm4, %v1005_v57  ;;  %v2025_v58 = vpop.f32.mrb[5].mxu0 }
 0x5d0   : > { %v1008_v59 = vpop.f32.mrb[6].mxu0 }
 0x5d1   : > { %v2026_v60 = vpop.f32.mrb[7].mxu0 }
 0x5d6   : > { %v1121_v61 = vpop.f32.mrb[8].mxu0 }
 0x5d7   : > { %1128 = vrot.lane.b32.xlu1 %v1121_v61, %s2325_s17  ;;  %v2037_v62 = vpop.f32.mrb[9].mxu0  ;;  %v1961_v61 = vld [vmem:[%s771_s3] ss:$0 sm:$0xff] }
 0x5d8   : > { %v1124_v63 = vpop.f32.mrb[10].mxu0 }
 0x5d9   : > { %v2038_v0 = vpop.f32.mrb[11].mxu0 }
 0x5fb   : > { %v1242_v3 = vpop.f32.mrb[12].mxu0 }
 0x5fc   : > { %1249 = vrot.lane.b32.xlu0 %v1242_v3, %s2326_s0  ;;  %v2049_v4 = vpop.f32.mrb[13].mxu0 }
 0x5fd   : > { %v1245_v5 = vpop.f32.mrb[14].mxu0 }
 0x5fe   : > { %v2050_v6 = vpop.f32.mrb[15].mxu0 }
 0x603   : > { %v1363_v7 = vpop.f32.mrb[16].mxu0 }
 0x604   : > { %1370 = vrot.lane.b32.xlu1 %v1363_v7, %s2327_s23  ;;  %v2061_v8 = vpop.f32.mrb[17].mxu0 }
 0x605   : > { %v1366_v9 = vpop.f32.mrb[18].mxu0 }
 0x606   : > { %v2062_v10 = vpop.f32.mrb[19].mxu0 }
 0x649   : > { %v1129_v11 = vpop.permute.xlu1 %1128 }
 0x64a   : > { %1132 = vst.msk [vmem:[#allocation4] sm:$0xff] %vm1131_vm6, %v1129_v11 }
 0x66e   : > { %v1250_v12 = vpop.permute.xlu0 %1249 }
 0x66f   : > { %1253 = vst.msk [vmem:[#allocation4] sm:$0xff] %vm1252_vm7, %v1250_v12 }
 0x676   : > { %v1371_v13 = vpop.permute.xlu1 %1370 }
 0x677   : > { %1374 = vst.msk [vmem:[#allocation4] sm:$0xff] %vm1373_vm8, %v1371_v13 }
 0x67e   : > { %v1375_v14 = vld [vmem:[#allocation4] sm:$0xff] }
 0x67f   : > { %v1376_v15 = vpack.c.bf16 %v1375_v14, %v1375_v14  ;;  %v1967_v14 = vld [vmem:[%s774_s15] ss:$0 sm:$0xff] }
 0x681   : > { %2068 = vmatmul.mubr.msk.bf16.vlgmr.msra.gmra.mrb[16].mxu1 %vm841_vm2, %v1376_v15 }
 0x682   : > { %2087 = vmatprep.mubr.msk.bf16.mxu1 %vm2313_vm1, %v2312_v17  ;;  %2080 = vmatpush3.bf16.msra.mxu1 %v2187_v43 }
 0x683   : > { %2081 = vmatprep.subr.bf16.mxu1 %v2312_v17 }
 0x686   : > { %2082 = vmatpush3.bf16.msra.mxu1 %v2188_v44 }
 0x687   : > { %2083 = vmatprep.subr.bf16.mxu1 %v2312_v17 }
 0x68a   : > { %2084 = vmatpush3.bf16.msra.mxu1 %v2189_v28 }
 0x68b   : > { %2085 = vmatprep.subr.bf16.mxu1 %v2312_v17 }
 0x68e   : > { %2086 = vmatpush3.bf16.msra.mxu1 %v2190_v45 }
 0x754   : > { %v1437_v18 = vpop.f32.mrb[16].mxu1 }
 0x755   : > { %v1438_v20 = vadd.f32 %v1951_v16, %v1437_v18  ;;  %v2069_v21 = vpop.f32.mrb[17].mxu1  ;;  %v1968_v16 = vld [vmem:[%s777_s10] ss:$0 sm:$0xff] }
 0x756   : > { %v1440_v22 = vpop.f32.mrb[18].mxu1  ;;  %v1669_v21 = vld [vmem:[%s2868_s4] sm:$0xff] (!%p1969_p1) }
 0x757   : > { %v2070_v23 = vpop.f32.mrb[19].mxu1  ;;  %v1443_v24 = vadd.f32 %v1438_v20, %v2585_v19  ;;  %v2328_v22 = vmov (!%p1969_p1), 0  }
 0x758   : > { %2213 = vset.pattern.permute.xlu0 (!%p1969_p1), %v2328_v22  ;;  %v1684_v23 = vsel (!%p1969_p1), %vm1683_vm10, %v1669_v21, 0.0 }
 0x759   : > { %v1446_v25 = vsel %vm841_vm2, %v1443_v24, 0.0 }
 0x75a   : > { %1447 = vadd.xlane.f32.xlu0 %v1446_v25 }
 0x7e7   : > { %v1448_v26 = vpop.xlane.xlu0 %1447 }
 0x7e8   : > { %v1450_v27 = vmul.f32 0.03125, %v1448_v26 }
 0x7ea   : > { %v1451_v29 = vsub.f32 %v1443_v24, %v1450_v27  ;;  %v1685_v24 = vrot.slane (!%p1969_p1), %v1684_v23, 4 }
 0x7ec   : > { %v1452_v30 = vmul.f32 %v1451_v29, %v1451_v29  ;;  %v1686_v25 = vadd.f32 (!%p1969_p1), %v1685_v24, %v1684_v23 }
 0x7ee   : > { %v1453_v31 = vsel %vm841_vm2, %v1452_v30, 0.0  ;;  %v1687_v26 = vrot.slane (!%p1969_p1), %v1686_v25, 2 }
 0x7ef   : > { %1454 = vadd.xlane.f32.xlu1 %v1453_v31 }
 0x7f0   : > { %v1688_v27 = vadd.f32 (!%p1969_p1), %v1687_v26, %v1686_v25 }
 0x87c   : > { %v1455_v19 = vpop.xlane.xlu1 %1454 }
 0x87d   : > { %v1456_v34 = vmul.f32 0.03125, %v1455_v19 }
 0x87f   : > { %v1457_v35 = vadd.f32 1e-05, %v1456_v34 }
 0x881   : > { %2207 = vrsqrt.f32 %v1457_v35 }
 0x88b   : > { %v2208_v36 = vpop.eup %2207 }
 0x88c   : > { %v1459_v38 = vmul.f32 %v2208_v36, %v1451_v29  ;;  %v1689_v29 = vrot.slane (!%p1969_p1), %v1688_v27, 1 }
 0x88e   : > { %v1466_v40 = vmul.f32 %v1955_v37, %v1459_v38  ;;  %v1690_v30 = vadd.f32 (!%p1969_p1), %v1689_v29, %v1688_v27 }
 0x890   : > { %v1473_v41 = vadd.f32 %v1956_v39, %v1466_v40  ;;  %v1691_v31 = vmax.f32 (!%p1969_p1), %v1690_v30, 1.0 }
 0x892   : > { %v1474_v42 = vpack.c.bf16 %v1473_v41, %v1473_v41 }
 0x894   : > { %2076 = vmatmul.mubr.msk.bf16.vlgmr.msra.gmra.mrb[20].mxu0 %vm841_vm2, %v1474_v42 }
 0x967   : > { %v1535_v47 = vpop.f32.mrb[20].mxu0 }
 0x968   : > { %v1536_v48 = vadd.f32 %v1957_v46, %v1535_v47  ;;  %v2077_v49 = vpop.f32.mrb[21].mxu0 }
 0x969   : > { %v1538_v50 = vpop.f32.mrb[22].mxu0 }
 0x96a   : > { %v1541_v51 = vmul.f32 %v1536_v48, %v1536_v48  ;;  %v2078_v52 = vpop.f32.mrb[23].mxu0 }
 0x96c   : > { %v1542_v53 = vmul.f32 %v1541_v51, %v1536_v48 }
 0x96e   : > { %v1543_v54 = vmul.f32 0.044715, %v1542_v53 }
 0x970   : > { %v1544_v55 = vadd.f32 %v1543_v54, %v1536_v48 }
 0x972   : > { %v1545_v56 = vmul.f32 0.7978846, %v1544_v55 }
 0x974   : > { %2209 = vtanh.f32 %v1545_v56 }
 0x97e   : > { %v2210_v17 = vpop.eup %2209 }
 0x97f   : > { %v1547_v57 = vadd.f32 1.0, %v2210_v17 }
 0x981   : > { %v1548_v58 = vmul.f32 0.5, %v1547_v57 }
 0x983   : > { %v1549_v59 = vmul.f32 %v1548_v58, %v1536_v48 }
 0x985   : > { %v1550_v60 = vpack.c.bf16 %v1549_v59, %v1549_v59 }
 0x987   : > { %2088 = vmatmul.mubr.msk.bf16.vlgmr.msra.gmra.mrb[20].mxu1 %vm1590_vm9, %v1550_v60 }
 0xa5a   : > { %v1628_v62 = vpop.f32.mrb[20].mxu1 }
 0xa5b   : > { %v1629_v63 = vadd.f32 %v1961_v61, %v1628_v62  ;;  %v2089_v0 = vpop.f32.mrb[21].mxu1 }
 0xa5c   : > { %v1631_v1 = vpop.f32.mrb[22].mxu1 }
 0xa5d   : > { %v2090_v2 = vpop.f32.mrb[23].mxu1  ;;  %v1634_v3 = vadd.f32 %v1629_v63, %v1473_v41 }
 0xa5f   : > { %v1637_v4 = vsel %vm841_vm2, %v1634_v3, 0.0 }
 0xa60   : > { %1638 = vadd.xlane.f32.xlu0 %v1637_v4 }
 0xaed   : > { %v1639_v5 = vpop.xlane.xlu0 %1638 }
 0xaee   : > { %v1640_v6 = vmul.f32 0.03125, %v1639_v5 }
 0xaf0   : > { %v1641_v7 = vsub.f32 %v1634_v3, %v1640_v6 }
 0xaf2   : > { %v1642_v8 = vmul.f32 %v1641_v7, %v1641_v7 }
 0xaf4   : > { %v1643_v9 = vsel %vm841_vm2, %v1642_v8, 0.0 }
 0xaf5   : > { %1644 = vadd.xlane.f32.xlu0 %v1643_v9 }
 0xb0b   : > { %1672 = vperm.xlu0 (!%p1969_p1), %2213, %v1669_v21  }
 0xb0f   : > { %1694 = vperm.xlu0 (!%p1969_p1), %2213, %v1691_v31  }
 0xb82   : > { %v1645_v10 = vpop.xlane.xlu0 %1644 }
 0xb83   : > { %v1646_v11 = vmul.f32 0.03125, %v1645_v10 }
 0xb85   : > { %v1647_v12 = vadd.f32 1e-05, %v1646_v11 }
 0xb87   : > { %2211 = vrsqrt.f32 %v1647_v12 }
 0xb8a   : > { %v1673_v32 = vpop.permute.xlu0 (!%p1969_p1), %1672 }
 0xb8e   : > { %v1695_v37 = vpop.permute.xlu0 (!%p1969_p1), %1694 }
 0xb8f   : > { %2214 = vrcp.f32 (!%p1969_p1), %v1695_v37 }
 0xb91   : > { %v2212_v13 = vpop.eup %2211 }
 0xb92   : > { %v1649_v15 = vmul.f32 %v2212_v13, %v1641_v7  ;;  %1668 = sbr.rel (%p1969_p1) target bundleno = 2986 (0xbaa), region = 96 }
 0xb94   : > { %v1656_v18 = vmul.f32 %v1967_v14, %v1649_v15 }
 0xb96   : > { %v1663_v20 = vadd.f32 %v1968_v16, %v1656_v18 }
 0xb98   : > { %1664 = vst.msk [vmem:[#allocation2] sm:$0xff] %vm841_vm2, %v1663_v20  ;;  %v1675_v33 = vmul.f32 (!%p1969_p1), %v1673_v32, %v1663_v20 }
 0xb99   : > { %v2215_v41 = vpop.eup %2214 }
 0xb9a   : > { %v1676_v19 = vsel %vm841_vm2, %v1675_v33, 0.0 }
 0xb9b   : > { %v1677_v34 = vrot.slane %v1676_v19, 4 }
 0xb9d   : > { %v1678_v35 = vadd.f32 %v1677_v34, %v1676_v19 }
 0xb9f   : > { %v1679_v36 = vrot.slane %v1678_v35, 2 }
 0xba1   : > { %v1680_v38 = vadd.f32 %v1679_v36, %v1678_v35 }
 0xba3   : > { %v1681_v39 = vrot.slane %v1680_v38, 1 }
 0xba5   : > { %v1682_v40 = vadd.f32 %v1681_v39, %v1680_v38 }
 0xba7   : > { %v1698_v42 = vmul.f32 %v2215_v41, %v1682_v40 }
 0xba9   : > { %1700 = vst.msk [vmem:[%s2567_s26] sm:$0x1] %vm1699_vm11, %v1698_v42 }
 0xbaa PF: > { %s2869_s10 = sld [smem:[#allocation11_spill]]  ;;  %s2871_s2 = sld [smem:[#allocation32_spill]] }
 0xbab   : > { %s1714_s11 = sshll.u32 %s2567_s26, 4  ;;  %s2872_s16 = sand.u32 1, %s2286_s25   ;;  %s1715_s11 = int_to_ptr.vmem [resolvable:$true] %s1714_s11 }
 0xbac   : > { %s1702_s28 = scalar_lea.sflag [#allocation6], %s2872_s16  ;;  %s2216_s5 = scalar_lea.vmem %s1715_s11, 16 }
 0xbad   : > { %p2217_p2 = scmp.ne.s32.totalorder %s1715_s11, %s2216_s5  ;;  %s2329_s29 = smov [#allocation5]  }
 0xbae   : > { %s2220_s30 = sshll.u32 %s2329_s29, 4  ;;  %s2221_s30 = int_to_ptr.vmem [resolvable:$false] %s2220_s30 }
 0xbaf   : > { %p2218_p4 = pnand %p2217_p2, %p2469_p3  ;;  %s2222_s21 = scalar_lea.vmem %s2221_s30, 32 }
 0xbb0   : > { %s1970_s15 = sshll.u32 %s2869_s10, 4  ;;  %p2223_p6 = scmp.lt.s32.totalorder %s1715_s11, %s2221_s30 }
 0xbb1   : > { %s2736_s7 = scalar_lea.hbm %s2871_s2, %s1970_s15  ;;  %p2219_p5 = pneg %p2218_p4 }
 0xbb2   : > { %p2224_p7 = scmp.lt.s32.totalorder %s2222_s21, %s2216_s5 }
 0xbb4   : > { %p2225_p8 = por %p2224_p7, %p2223_p6 }
 0xbb6   : > { %p2226_p10 = pnand %p2225_p8, %p2219_p5 }
 0xbb8   : > { %2229 = shalt.err (!%p2226_p10)
}
 0xbb9   : > { %s2230_s26 = scalar_lea.hbm %s2736_s7, 16  ;;  %s2234_s1 = scalar_lea.hbm %s2871_s2, 32 }
 0xbba   : > { %p2231_p11 = scmp.ne.s32.totalorder %s2736_s7, %s2230_s26  ;;  %p2235_p0 = scmp.lt.u32.totalorder %s2736_s7, %s2871_s2 }
 0xbbb   : > { %p2236_p1 = scmp.lt.u32.totalorder %s2234_s1, %s2230_s26  ;;  %p2238_p4 = scmp.lt.u32.totalorder %s2230_s26, %s2736_s7 }
 0xbbc   : > { %p2232_p12 = pnand %p2231_p11, %p2469_p3 }
 0xbbd   : > { %p2237_p2 = por %p2236_p1, %p2235_p0 }
 0xbbe   : > { %p2233_p13 = pneg %p2232_p12 }
 0xbbf   : > { %p2239_p5 = por %p2238_p4, %p2237_p2 }
 0xbc1   : > { %p2240_p6 = pnand %p2239_p5, %p2233_p13 }
 0xbc3   : > { %2243 = shalt.err (!%p2240_p6)
}
 0xbc4   : > { %2091 = dma.vmem_to_hbm [thread:$0]  (%p2469_p3), %s1715_s11, 16, %s2736_s7, %s1702_s28  }
 0xbc5 PF: > { %s2873_s23 = sld [smem:[#allocation14_spill]]  ;;  %s2874_s24 = sld [smem:[#allocation8_spill]] }
 0xbcb   : > { %p2097_p7 = scmp.ge.s32.totalorder %s2873_s23, 2  ;;  %s1726_s4 = sand.u32 1, %s2874_s24  }
 0xbcc   : > { %s1727_s10 = scalar_lea.sflag [#allocation6], %s1726_s4 }
 0xbcd   : > { %p2094_p8 = pnand %p2097_p7, %p2479_p9 }
 0xbcf   : > { %2277 = dma.done.wait (!%p2094_p8), %s1727_s10, 16  }
 0xbd0   : > { %2279 = vsyncadd (!%p2094_p8), %s1727_s10, 4294967280  ;;  %s30_s30 = sadd.s32 1, %s2873_s23   ;;  %s2876_s15 = sld [smem:[#allocation9_spill]] }
 0xbd1   : > { %p27_p10 = scmp.ge.s32.totalorder %s30_s30, 6   ;;  %s2877_s26 = sld [smem:[#allocation19_spill]] }
 0xbd2   : > { %s2878_s27 = sld [smem:[#allocation12_spill]]  ;;  %s2879_s28 = sld [smem:[#allocation13_spill]] }
 0xbd3   : > { %s2880_s29 = sld [smem:[#allocation15_spill]]  ;;  %s2881_s0 = sld [smem:[#allocation17_spill]] }
 0xbd4   : > { %s2882_s24 = smov %s2286_s25  ;;  %29 = sbr.rel (!%p27_p10) target bundleno = 18 (0x12), region = 173 }
 0xbd6   : > { %s2883_s25 = smov %s2876_s15 }
 0xbdb   :  { %1731 = vsyncpa [#allocation6], 1 }
 0xbdc   :  { %1733 = vsyncpa [#allocation6 + $0x1], 1 }

</bundles_post_ra>
